<compile_context>
chip_gen: v5e
topology: v5e:2x2
jax: 0.10.0
libtpu: 0.0.40
codegen_flags: <defaults>
</compile_context>

<pallas_src>
import jax
import jax.numpy as jnp
from jax.experimental import pallas as pl
from jax.experimental.pallas import tpu as pltpu

INPUT = 8
SEQ = 8
HIDDEN = 64          # hidden size (no lane padding anymore)
NUM_CLASSES = 4
TB_MAX = 512         # max batch rows per grid block (VMEM-safe everywhere)


# --------------------------------------------------------------------------
# Kernel
# --------------------------------------------------------------------------
def lstm_fc_kernel(x_ref, wih0_ref, whh0_ref, b0_ref,
                   w1a_ref, w1b_ref, b1_ref, wfc_ref, bfc_ref, out_ref):
    """One batch block: full 2-layer LSTM recurrence over SEQ steps + Linear.

    x_ref:    (SEQ, TB, INPUT)   time-major input block
    wih0_ref: (INPUT, 4*H)       layer-0 input weights (gate order i,f,o,g;
                                 i/f/o columns carry a folded 0.5)
    whh0_ref: (H, 4*H)           layer-0 recurrent weights (same packing)
    b0_ref:   (1, 4*H)           layer-0 combined bias (same packing)
    w1a_ref:  (H, 4*H)           layer-1 input (ih) weights
    w1b_ref:  (H, 4*H)           layer-1 recurrent (hh) weights
    b1_ref:   (1, 4*H)           layer-1 combined bias
    wfc_ref:  (H, NUM_CLASSES)   final linear weights
    bfc_ref:  (1, NUM_CLASSES)
    out_ref:  (TB, NUM_CLASSES)
    """
    seq, tb, _ = x_ref.shape                     # static block shape
    H = HIDDEN
    G = 4 * H

    # ---- hoisted layer-0 input projection: all timesteps in ONE matmul ----
    x2d = x_ref[...].reshape(seq * tb, INPUT)                      # (SEQ*TB, 8)
    xp = (jnp.dot(x2d, wih0_ref[...], preferred_element_type=jnp.float32)
          + b0_ref[...])                                           # (SEQ*TB, 4H)

    whh0 = whh0_ref[...]                                           # (H, 4H)
    w1a = w1a_ref[...]                                             # (H, 4H)
    w1b = w1b_ref[...]                                             # (H, 4H)
    # hoisted bias broadcast (JAX does not CSE broadcast_in_dim in the unroll)
    b1b = jnp.broadcast_to(b1_ref[...], (tb, G))

    # Gate columns packed (i, f, o, g).  The i/f/o pre-activations already
    # carry a folded 0.5 (see pack_params), so sigmoid(x) = 0.5*tanh(x/2)+0.5
    # becomes a single tanh over all 4*H lanes plus a lane-masked affine.
    lane = jax.lax.broadcasted_iota(jnp.int32, (tb, G), 1)
    is_sig = lane < 3 * H                                          # hoisted mask

    def cell(gates, c):
        th = jnp.tanh(gates)                       # one EUP pass, 4*H lanes
        act = jnp.where(is_sig, 0.5 * th + 0.5, th)
        i_g = act[:, 0:H]
        f_g = act[:, H:2 * H]
        o_g = act[:, 2 * H:3 * H]
        g_g = act[:, 3 * H:]
        c_new = f_g * c + i_g * g_g
        h_new = o_g * jnp.tanh(c_new)
        return h_new, c_new

    h0 = jnp.zeros((tb, H), jnp.float32)
    c0 = jnp.zeros((tb, H), jnp.float32)
    h1 = jnp.zeros((tb, H), jnp.float32)
    c1 = jnp.zeros((tb, H), jnp.float32)

    for t in range(SEQ):                          # static unroll (SEQ == 8)
        # layer 0: precomputed input projection + recurrent matmul only
        g0 = xp[t * tb:(t + 1) * tb, :] + jnp.dot(
            h0, whh0, preferred_element_type=jnp.float32)
        h0, c0 = cell(g0, c0)

        # layer 1: two small dots (no per-step [h0 | h1] concat copy)
        g1 = (jnp.dot(h0, w1a, preferred_element_type=jnp.float32)
              + jnp.dot(h1, w1b, preferred_element_type=jnp.float32)
              + b1b)
        h1, c1 = cell(g1, c1)

    # final Linear on the last-timestep top-layer hidden state
    out_ref[...] = (jnp.dot(h1, wfc_ref[...],
                            preferred_element_type=jnp.float32)
                    + bfc_ref[...]).astype(out_ref.dtype)


# --------------------------------------------------------------------------
# Wrapper
# --------------------------------------------------------------------------
def _choose_tb(b_rows):
    """Batch-block rows: multiple of 8, <= TB_MAX, and small enough that the
    grid has >= 2 steps when possible (so both v7x TensorCores get work)."""
    if b_rows <= 8:
        return 8
    half = (((b_rows + 1) // 2) + 7) // 8 * 8     # round_up(ceil(b/2), 8)
    return min(TB_MAX, half)


@jax.jit
def lstm_model_forward(x, kp):
    """x: (B, 64) or (B, 8, 8). Mirrors PyTorch forward (view -> lstm -> fc)."""
    x = x.reshape(-1, SEQ, INPUT).astype(jnp.float32)      # x.view(-1, 8, 8)
    B = x.shape[0]

    # batch tiling: TB multiple of 8, batch padded to a multiple of TB
    b_rows = max(8, ((B + 7) // 8) * 8)
    tb = _choose_tb(b_rows)
    b_pad = ((b_rows + tb - 1) // tb) * tb

    x_tm = jnp.transpose(x, (1, 0, 2))                      # time-major (SEQ, B, I)
    if b_pad != B:
        x_tm = jnp.pad(x_tm, ((0, 0), (0, b_pad - B), (0, 0)))

    grid = (b_pad // tb,)

    def wspec(shape):
        # weights: whole array, same block every grid step -> stays VMEM-
        # resident.  (pipeline_mode=pl.Buffered(1) would save the second
        # buffer, but weights total < 0.5 MiB; left default for robustness.)
        return pl.BlockSpec(shape, lambda i: (0, 0))

    out = pl.pallas_call(
        lstm_fc_kernel,
        out_shape=jax.ShapeDtypeStruct((b_pad, NUM_CLASSES), jnp.float32),
        grid=grid,
        in_specs=[
            pl.BlockSpec((SEQ, tb, INPUT), lambda i: (0, i, 0)),   # x (batch block)
            wspec((INPUT, 4 * HIDDEN)),                            # wih0
            wspec((HIDDEN, 4 * HIDDEN)),                           # whh0
            wspec((1, 4 * HIDDEN)),                                # b0
            wspec((HIDDEN, 4 * HIDDEN)),                           # w1a (layer-1 ih)
            wspec((HIDDEN, 4 * HIDDEN)),                           # w1b (layer-1 hh)
            wspec((1, 4 * HIDDEN)),                                # b1
            wspec((HIDDEN, NUM_CLASSES)),                          # wfc
            wspec((1, NUM_CLASSES)),                               # bfc
        ],
        out_specs=pl.BlockSpec((tb, NUM_CLASSES), lambda i: (i, 0)),
        compiler_params=pltpu.CompilerParams(
            dimension_semantics=("parallel",),
            vmem_limit_bytes=32 * 1024 * 1024,
        ),
    )(x_tm, kp["wih0"], kp["whh0"], kp["b0"],
      kp["w1a"], kp["w1b"], kp["b1"], kp["wfc"], kp["bfc"])

    return out[:B]


# --------------------------------------------------------------------------
# Parameter construction (PyTorch layout) and packing to kernel layout
# --------------------------------------------------------------------------
def init_raw_params(key):
    """PyTorch-shaped params with U(-1/sqrt(H), 1/sqrt(H)) init."""
    H = HIDDEN
    bound = 1.0 / float(jnp.sqrt(jnp.float32(H)))
    keys = jax.random.split(key, 10)

    def u(k, shape):
        return jax.random.uniform(k, shape, jnp.float32, -bound, bound)

    return {
        "w_ih_l0": u(keys[0], (4 * H, INPUT)),
        "w_hh_l0": u(keys[1], (4 * H, H)),
        "b_ih_l0": u(keys[2], (4 * H,)),
        "b_hh_l0": u(keys[3], (4 * H,)),
        "w_ih_l1": u(keys[4], (4 * H, H)),
        "w_hh_l1": u(keys[5], (4 * H, H)),
        "b_ih_l1": u(keys[6], (4 * H,)),
        "b_hh_l1": u(keys[7], (4 * H,)),
        "w_fc":    u(keys[8], (NUM_CLASSES, H)),
        "b_fc":    u(keys[9], (NUM_CLASSES,)),
    }


def pack_params(raw):
    """PyTorch layout -> kernel layout (no lane padding).

    Gate order is reordered (i,f,g,o) -> (i,f,o,g).  The i/f/o columns (and
    bias entries) are pre-scaled by 0.5 so the kernel can evaluate
    sigmoid(x) = 0.5*tanh(x/2) + 0.5 with a single tanh over all gates;
    scaling by 0.5 is exact in fp32, so pre-activations are bit-identical to
    0.5 * (original pre-activation).  Layer-1 ih/hh stay split (two dots in
    the kernel, no per-step concat).
    """
    H = HIDDEN

    def reorder_scale(wt):   # wt: (in_dim, 4H), pytorch gate order i,f,g,o
        i_w, f_w, g_w, o_w = (wt[:, k * H:(k + 1) * H] for k in range(4))
        return jnp.concatenate([0.5 * i_w, 0.5 * f_w, 0.5 * o_w, g_w], axis=1)

    return {
        "wih0": reorder_scale(raw["w_ih_l0"].T),                         # (8, 256)
        "whh0": reorder_scale(raw["w_hh_l0"].T),                         # (64, 256)
        "b0":   reorder_scale((raw["b_ih_l0"] + raw["b_hh_l0"])[None]),  # (1, 256)
        "w1a":  reorder_scale(raw["w_ih_l1"].T),                         # (64, 256)
        "w1b":  reorder_scale(raw["w_hh_l1"].T),                         # (64, 256)
        "b1":   reorder_scale((raw["b_ih_l1"] + raw["b_hh_l1"])[None]),  # (1, 256)
        "wfc":  raw["w_fc"].T,                                           # (64, 4)
        "bfc":  raw["b_fc"][None, :],                                    # (1, 4)
    }


# --------------------------------------------------------------------------
# Pure-JAX reference (PyTorch-layout math) for correctness checking
# --------------------------------------------------------------------------
def _reference_forward(x, raw):
    x = x.reshape(-1, SEQ, INPUT).astype(jnp.float32)
    B, H = x.shape[0], HIDDEN
    h0 = jnp.zeros((B, H)); c0 = jnp.zeros((B, H))
    h1 = jnp.zeros((B, H)); c1 = jnp.zeros((B, H))

    def cell(x_t, h, c, w_ih, w_hh, b_ih, b_hh):
        g = x_t @ w_ih.T + h @ w_hh.T + b_ih + b_hh
        i = jax.nn.sigmoid(g[:, 0:H])
        f = jax.nn.sigmoid(g[:, H:2 * H])
        gg = jnp.tanh(g[:, 2 * H:3 * H])
        o = jax.nn.sigmoid(g[:, 3 * H:4 * H])
        c = f * c + i * gg
        return o * jnp.tanh(c), c

    for t in range(SEQ):
        h0, c0 = cell(x[:, t, :], h0, c0, raw["w_ih_l0"], raw["w_hh_l0"],
                      raw["b_ih_l0"], raw["b_hh_l0"])
        h1, c1 = cell(h0, h1, c1, raw["w_ih_l1"], raw["w_hh_l1"],
                      raw["b_ih_l1"], raw["b_hh_l1"])
    return h1 @ raw["w_fc"].T + raw["b_fc"]


# --------------------------------------------------------------------------
if __name__ == "__main__":
    key = jax.random.PRNGKey(0)
    pkey, xkey, xkey2 = jax.random.split(key, 3)
    raw = init_raw_params(pkey)
    kparams = pack_params(raw)

    # Input consistent with forward's x.view(-1, 8, 8): batch=4, features=64.
    x = jax.random.normal(xkey, (4, 64), jnp.float32)
    out = jax.block_until_ready(lstm_model_forward(x, kparams))
    ref = _reference_forward(x, raw)
    assert out.shape == (4, NUM_CLASSES)
    assert jnp.allclose(out, ref, atol=1e-4, rtol=1e-4), \
        float(jnp.max(jnp.abs(out - ref)))

    # Larger batch: exercises batch padding + the >=2-block parallel grid.
    xb = jax.random.normal(xkey2, (272, 64), jnp.float32)
    outb = jax.block_until_ready(lstm_model_forward(xb, kparams))
    refb = _reference_forward(xb, raw)
    assert outb.shape == (272, NUM_CLASSES)
    assert jnp.allclose(outb, refb, atol=1e-4, rtol=1e-4), \
        float(jnp.max(jnp.abs(outb - refb)))

    print("KERNEL_OK")
</pallas_src>

<mosaic_0001>
module attributes {stable_mosaic.version = 11 : i64} {
  func.func @lstm_fc_kernel(%arg0: i32, %arg1: memref<8x8x8xf32, #tpu.memory_space<vmem>>, %arg2: memref<8x256xf32, #tpu.memory_space<vmem>>, %arg3: memref<64x256xf32, #tpu.memory_space<vmem>>, %arg4: memref<1x256xf32, #tpu.memory_space<vmem>>, %arg5: memref<64x256xf32, #tpu.memory_space<vmem>>, %arg6: memref<64x256xf32, #tpu.memory_space<vmem>>, %arg7: memref<1x256xf32, #tpu.memory_space<vmem>>, %arg8: memref<64x4xf32, #tpu.memory_space<vmem>>, %arg9: memref<1x4xf32, #tpu.memory_space<vmem>>, %arg10: memref<8x4xf32, #tpu.memory_space<vmem>>) attributes {dimension_semantics = [#tpu.dimension_semantics<parallel>], iteration_bounds = array<i64: 1>, scalar_prefetch = 0 : i64, scratch_operands = 0 : i64, tpu.core_type = #tpu.core_type<tc>, window_params = [{transform_indices = @transform_0, window_bounds = array<i64: 8, 8, 8>}, {pipeline_mode = #tpu.pipeline_mode<synchronous>, transform_indices = @transform_1, window_bounds = array<i64: 8, 256>}, {pipeline_mode = #tpu.pipeline_mode<synchronous>, transform_indices = @transform_2, window_bounds = array<i64: 64, 256>}, {pipeline_mode = #tpu.pipeline_mode<synchronous>, transform_indices = @transform_3, window_bounds = array<i64: 1, 256>}, {pipeline_mode = #tpu.pipeline_mode<synchronous>, transform_indices = @transform_4, window_bounds = array<i64: 64, 256>}, {pipeline_mode = #tpu.pipeline_mode<synchronous>, transform_indices = @transform_5, window_bounds = array<i64: 64, 256>}, {pipeline_mode = #tpu.pipeline_mode<synchronous>, transform_indices = @transform_6, window_bounds = array<i64: 1, 256>}, {pipeline_mode = #tpu.pipeline_mode<synchronous>, transform_indices = @transform_7, window_bounds = array<i64: 64, 4>}, {pipeline_mode = #tpu.pipeline_mode<synchronous>, transform_indices = @transform_8, window_bounds = array<i64: 1, 4>}, {transform_indices = @transform_9, window_bounds = array<i64: 8, 4>}]} {
    %c0 = arith.constant 0 : index
    %c0_0 = arith.constant 0 : index
    %c0_1 = arith.constant 0 : index
    %0 = vector.load %arg1[%c0, %c0_0, %c0_1] : memref<8x8x8xf32, #tpu.memory_space<vmem>>, vector<8x8x8xf32>
    %1 = vector.shape_cast %0 : vector<8x8x8xf32> to vector<64x8xf32>
    %c0_2 = arith.constant 0 : index
    %c0_3 = arith.constant 0 : index
    %2 = vector.load %arg2[%c0_2, %c0_3] : memref<8x256xf32, #tpu.memory_space<vmem>>, vector<8x256xf32>
    %cst = arith.constant dense<0.000000e+00> : vector<64x256xf32>
    %3 = tpu.matmul %1, %2, %cst {dimension_numbers = #tpu.dot_dimension_numbers<[1], [0], [0], [1], [0, 0, 1, 1], [], []>} : vector<64x8xf32>, vector<8x256xf32>, vector<64x256xf32> -> vector<64x256xf32>
    %c0_4 = arith.constant 0 : index
    %c0_5 = arith.constant 0 : index
    %4 = vector.load %arg4[%c0_4, %c0_5] : memref<1x256xf32, #tpu.memory_space<vmem>>, vector<1x256xf32>
    %5 = vector.broadcast %4 : vector<1x256xf32> to vector<64x256xf32>
    %6 = arith.addf %3, %5 : vector<64x256xf32>
    %c0_6 = arith.constant 0 : index
    %c0_7 = arith.constant 0 : index
    %7 = vector.load %arg3[%c0_6, %c0_7] : memref<64x256xf32, #tpu.memory_space<vmem>>, vector<64x256xf32>
    %c0_8 = arith.constant 0 : index
    %c0_9 = arith.constant 0 : index
    %8 = vector.load %arg5[%c0_8, %c0_9] : memref<64x256xf32, #tpu.memory_space<vmem>>, vector<64x256xf32>
    %c0_10 = arith.constant 0 : index
    %c0_11 = arith.constant 0 : index
    %9 = vector.load %arg6[%c0_10, %c0_11] : memref<64x256xf32, #tpu.memory_space<vmem>>, vector<64x256xf32>
    %c0_12 = arith.constant 0 : index
    %c0_13 = arith.constant 0 : index
    %10 = vector.load %arg7[%c0_12, %c0_13] : memref<1x256xf32, #tpu.memory_space<vmem>>, vector<1x256xf32>
    %11 = vector.shape_cast %10 : vector<1x256xf32> to vector<1x256xf32>
    %12 = vector.broadcast %11 : vector<1x256xf32> to vector<8x256xf32>
    %13 = tpu.iota {dimensions = array<i32: 1>} : vector<8x256xi32>
    %c192_i32 = arith.constant 192 : i32
    %14 = vector.broadcast %c192_i32 : i32 to vector<8x256xi32>
    %15 = arith.cmpi slt, %13, %14 : vector<8x256xi32>
    %cst_14 = arith.constant 0.000000e+00 : f32
    %16 = vector.broadcast %cst_14 : f32 to vector<8x64xf32>
    %cst_15 = arith.constant 0.000000e+00 : f32
    %17 = vector.broadcast %cst_15 : f32 to vector<8x64xf32>
    %cst_16 = arith.constant 0.000000e+00 : f32
    %18 = vector.broadcast %cst_16 : f32 to vector<8x64xf32>
    %cst_17 = arith.constant 0.000000e+00 : f32
    %19 = vector.broadcast %cst_17 : f32 to vector<8x64xf32>
    %20 = vector.extract_strided_slice %6 {offsets = [0, 0], sizes = [8, 256], strides = [1, 1]} : vector<64x256xf32> to vector<8x256xf32>
    %cst_18 = arith.constant dense<0.000000e+00> : vector<8x256xf32>
    %21 = tpu.matmul %16, %7, %cst_18 {dimension_numbers = #tpu.dot_dimension_numbers<[1], [0], [0], [1], [0, 0, 1, 1], [], []>} : vector<8x64xf32>, vector<64x256xf32>, vector<8x256xf32> -> vector<8x256xf32>
    %22 = arith.addf %20, %21 : vector<8x256xf32>
    %23 = math.tanh %22 : vector<8x256xf32>
    %cst_19 = arith.constant 5.000000e-01 : f32
    %24 = vector.broadcast %cst_19 : f32 to vector<8x256xf32>
    %25 = arith.mulf %24, %23 : vector<8x256xf32>
    %cst_20 = arith.constant 5.000000e-01 : f32
    %26 = vector.broadcast %cst_20 : f32 to vector<8x256xf32>
    %27 = arith.addf %25, %26 : vector<8x256xf32>
    %28 = arith.select %15, %27, %23 : vector<8x256xi1>, vector<8x256xf32>
    %29 = vector.extract_strided_slice %28 {offsets = [0, 0], sizes = [8, 64], strides = [1, 1]} : vector<8x256xf32> to vector<8x64xf32>
    %30 = vector.extract_strided_slice %28 {offsets = [0, 64], sizes = [8, 64], strides = [1, 1]} : vector<8x256xf32> to vector<8x64xf32>
    %31 = vector.extract_strided_slice %28 {offsets = [0, 128], sizes = [8, 64], strides = [1, 1]} : vector<8x256xf32> to vector<8x64xf32>
    %32 = vector.extract_strided_slice %28 {offsets = [0, 192], sizes = [8, 64], strides = [1, 1]} : vector<8x256xf32> to vector<8x64xf32>
    %33 = arith.mulf %30, %17 : vector<8x64xf32>
    %34 = arith.mulf %29, %32 : vector<8x64xf32>
    %35 = arith.addf %33, %34 : vector<8x64xf32>
    %36 = math.tanh %35 : vector<8x64xf32>
    %37 = arith.mulf %31, %36 : vector<8x64xf32>
    %cst_21 = arith.constant dense<0.000000e+00> : vector<8x256xf32>
    %38 = tpu.matmul %37, %8, %cst_21 {dimension_numbers = #tpu.dot_dimension_numbers<[1], [0], [0], [1], [0, 0, 1, 1], [], []>} : vector<8x64xf32>, vector<64x256xf32>, vector<8x256xf32> -> vector<8x256xf32>
    %cst_22 = arith.constant dense<0.000000e+00> : vector<8x256xf32>
    %39 = tpu.matmul %18, %9, %cst_22 {dimension_numbers = #tpu.dot_dimension_numbers<[1], [0], [0], [1], [0, 0, 1, 1], [], []>} : vector<8x64xf32>, vector<64x256xf32>, vector<8x256xf32> -> vector<8x256xf32>
    %40 = arith.addf %38, %39 : vector<8x256xf32>
    %41 = arith.addf %40, %12 : vector<8x256xf32>
    %42 = math.tanh %41 : vector<8x256xf32>
    %cst_23 = arith.constant 5.000000e-01 : f32
    %43 = vector.broadcast %cst_23 : f32 to vector<8x256xf32>
    %44 = arith.mulf %43, %42 : vector<8x256xf32>
    %cst_24 = arith.constant 5.000000e-01 : f32
    %45 = vector.broadcast %cst_24 : f32 to vector<8x256xf32>
    %46 = arith.addf %44, %45 : vector<8x256xf32>
    %47 = arith.select %15, %46, %42 : vector<8x256xi1>, vector<8x256xf32>
    %48 = vector.extract_strided_slice %47 {offsets = [0, 0], sizes = [8, 64], strides = [1, 1]} : vector<8x256xf32> to vector<8x64xf32>
    %49 = vector.extract_strided_slice %47 {offsets = [0, 64], sizes = [8, 64], strides = [1, 1]} : vector<8x256xf32> to vector<8x64xf32>
    %50 = vector.extract_strided_slice %47 {offsets = [0, 128], sizes = [8, 64], strides = [1, 1]} : vector<8x256xf32> to vector<8x64xf32>
    %51 = vector.extract_strided_slice %47 {offsets = [0, 192], sizes = [8, 64], strides = [1, 1]} : vector<8x256xf32> to vector<8x64xf32>
    %52 = arith.mulf %49, %19 : vector<8x64xf32>
    %53 = arith.mulf %48, %51 : vector<8x64xf32>
    %54 = arith.addf %52, %53 : vector<8x64xf32>
    %55 = math.tanh %54 : vector<8x64xf32>
    %56 = arith.mulf %50, %55 : vector<8x64xf32>
    %57 = vector.extract_strided_slice %6 {offsets = [8, 0], sizes = [8, 256], strides = [1, 1]} : vector<64x256xf32> to vector<8x256xf32>
    %cst_25 = arith.constant dense<0.000000e+00> : vector<8x256xf32>
    %58 = tpu.matmul %37, %7, %cst_25 {dimension_numbers = #tpu.dot_dimension_numbers<[1], [0], [0], [1], [0, 0, 1, 1], [], []>} : vector<8x64xf32>, vector<64x256xf32>, vector<8x256xf32> -> vector<8x256xf32>
    %59 = arith.addf %57, %58 : vector<8x256xf32>
    %60 = math.tanh %59 : vector<8x256xf32>
    %cst_26 = arith.constant 5.000000e-01 : f32
    %61 = vector.broadcast %cst_26 : f32 to vector<8x256xf32>
    %62 = arith.mulf %61, %60 : vector<8x256xf32>
    %cst_27 = arith.constant 5.000000e-01 : f32
    %63 = vector.broadcast %cst_27 : f32 to vector<8x256xf32>
    %64 = arith.addf %62, %63 : vector<8x256xf32>
    %65 = arith.select %15, %64, %60 : vector<8x256xi1>, vector<8x256xf32>
    %66 = vector.extract_strided_slice %65 {offsets = [0, 0], sizes = [8, 64], strides = [1, 1]} : vector<8x256xf32> to vector<8x64xf32>
    %67 = vector.extract_strided_slice %65 {offsets = [0, 64], sizes = [8, 64], strides = [1, 1]} : vector<8x256xf32> to vector<8x64xf32>
    %68 = vector.extract_strided_slice %65 {offsets = [0, 128], sizes = [8, 64], strides = [1, 1]} : vector<8x256xf32> to vector<8x64xf32>
    %69 = vector.extract_strided_slice %65 {offsets = [0, 192], sizes = [8, 64], strides = [1, 1]} : vector<8x256xf32> to vector<8x64xf32>
    %70 = arith.mulf %67, %35 : vector<8x64xf32>
    %71 = arith.mulf %66, %69 : vector<8x64xf32>
    %72 = arith.addf %70, %71 : vector<8x64xf32>
    %73 = math.tanh %72 : vector<8x64xf32>
    %74 = arith.mulf %68, %73 : vector<8x64xf32>
    %cst_28 = arith.constant dense<0.000000e+00> : vector<8x256xf32>
    %75 = tpu.matmul %74, %8, %cst_28 {dimension_numbers = #tpu.dot_dimension_numbers<[1], [0], [0], [1], [0, 0, 1, 1], [], []>} : vector<8x64xf32>, vector<64x256xf32>, vector<8x256xf32> -> vector<8x256xf32>
    %cst_29 = arith.constant dense<0.000000e+00> : vector<8x256xf32>
    %76 = tpu.matmul %56, %9, %cst_29 {dimension_numbers = #tpu.dot_dimension_numbers<[1], [0], [0], [1], [0, 0, 1, 1], [], []>} : vector<8x64xf32>, vector<64x256xf32>, vector<8x256xf32> -> vector<8x256xf32>
    %77 = arith.addf %75, %76 : vector<8x256xf32>
    %78 = arith.addf %77, %12 : vector<8x256xf32>
    %79 = math.tanh %78 : vector<8x256xf32>
    %cst_30 = arith.constant 5.000000e-01 : f32
    %80 = vector.broadcast %cst_30 : f32 to vector<8x256xf32>
    %81 = arith.mulf %80, %79 : vector<8x256xf32>
    %cst_31 = arith.constant 5.000000e-01 : f32
    %82 = vector.broadcast %cst_31 : f32 to vector<8x256xf32>
    %83 = arith.addf %81, %82 : vector<8x256xf32>
    %84 = arith.select %15, %83, %79 : vector<8x256xi1>, vector<8x256xf32>
    %85 = vector.extract_strided_slice %84 {offsets = [0, 0], sizes = [8, 64], strides = [1, 1]} : vector<8x256xf32> to vector<8x64xf32>
    %86 = vector.extract_strided_slice %84 {offsets = [0, 64], sizes = [8, 64], strides = [1, 1]} : vector<8x256xf32> to vector<8x64xf32>
    %87 = vector.extract_strided_slice %84 {offsets = [0, 128], sizes = [8, 64], strides = [1, 1]} : vector<8x256xf32> to vector<8x64xf32>
    %88 = vector.extract_strided_slice %84 {offsets = [0, 192], sizes = [8, 64], strides = [1, 1]} : vector<8x256xf32> to vector<8x64xf32>
    %89 = arith.mulf %86, %54 : vector<8x64xf32>
    %90 = arith.mulf %85, %88 : vector<8x64xf32>
    %91 = arith.addf %89, %90 : vector<8x64xf32>
    %92 = math.tanh %91 : vector<8x64xf32>
    %93 = arith.mulf %87, %92 : vector<8x64xf32>
    %94 = vector.extract_strided_slice %6 {offsets = [16, 0], sizes = [8, 256], strides = [1, 1]} : vector<64x256xf32> to vector<8x256xf32>
    %cst_32 = arith.constant dense<0.000000e+00> : vector<8x256xf32>
    %95 = tpu.matmul %74, %7, %cst_32 {dimension_numbers = #tpu.dot_dimension_numbers<[1], [0], [0], [1], [0, 0, 1, 1], [], []>} : vector<8x64xf32>, vector<64x256xf32>, vector<8x256xf32> -> vector<8x256xf32>
    %96 = arith.addf %94, %95 : vector<8x256xf32>
    %97 = math.tanh %96 : vector<8x256xf32>
    %cst_33 = arith.constant 5.000000e-01 : f32
    %98 = vector.broadcast %cst_33 : f32 to vector<8x256xf32>
    %99 = arith.mulf %98, %97 : vector<8x256xf32>
    %cst_34 = arith.constant 5.000000e-01 : f32
    %100 = vector.broadcast %cst_34 : f32 to vector<8x256xf32>
    %101 = arith.addf %99, %100 : vector<8x256xf32>
    %102 = arith.select %15, %101, %97 : vector<8x256xi1>, vector<8x256xf32>
    %103 = vector.extract_strided_slice %102 {offsets = [0, 0], sizes = [8, 64], strides = [1, 1]} : vector<8x256xf32> to vector<8x64xf32>
    %104 = vector.extract_strided_slice %102 {offsets = [0, 64], sizes = [8, 64], strides = [1, 1]} : vector<8x256xf32> to vector<8x64xf32>
    %105 = vector.extract_strided_slice %102 {offsets = [0, 128], sizes = [8, 64], strides = [1, 1]} : vector<8x256xf32> to vector<8x64xf32>
    %106 = vector.extract_strided_slice %102 {offsets = [0, 192], sizes = [8, 64], strides = [1, 1]} : vector<8x256xf32> to vector<8x64xf32>
    %107 = arith.mulf %104, %72 : vector<8x64xf32>
    %108 = arith.mulf %103, %106 : vector<8x64xf32>
    %109 = arith.addf %107, %108 : vector<8x64xf32>
    %110 = math.tanh %109 : vector<8x64xf32>
    %111 = arith.mulf %105, %110 : vector<8x64xf32>
    %cst_35 = arith.constant dense<0.000000e+00> : vector<8x256xf32>
    %112 = tpu.matmul %111, %8, %cst_35 {dimension_numbers = #tpu.dot_dimension_numbers<[1], [0], [0], [1], [0, 0, 1, 1], [], []>} : vector<8x64xf32>, vector<64x256xf32>, vector<8x256xf32> -> vector<8x256xf32>
    %cst_36 = arith.constant dense<0.000000e+00> : vector<8x256xf32>
    %113 = tpu.matmul %93, %9, %cst_36 {dimension_numbers = #tpu.dot_dimension_numbers<[1], [0], [0], [1], [0, 0, 1, 1], [], []>} : vector<8x64xf32>, vector<64x256xf32>, vector<8x256xf32> -> vector<8x256xf32>
    %114 = arith.addf %112, %113 : vector<8x256xf32>
    %115 = arith.addf %114, %12 : vector<8x256xf32>
    %116 = math.tanh %115 : vector<8x256xf32>
    %cst_37 = arith.constant 5.000000e-01 : f32
    %117 = vector.broadcast %cst_37 : f32 to vector<8x256xf32>
    %118 = arith.mulf %117, %116 : vector<8x256xf32>
    %cst_38 = arith.constant 5.000000e-01 : f32
    %119 = vector.broadcast %cst_38 : f32 to vector<8x256xf32>
    %120 = arith.addf %118, %119 : vector<8x256xf32>
    %121 = arith.select %15, %120, %116 : vector<8x256xi1>, vector<8x256xf32>
    %122 = vector.extract_strided_slice %121 {offsets = [0, 0], sizes = [8, 64], strides = [1, 1]} : vector<8x256xf32> to vector<8x64xf32>
    %123 = vector.extract_strided_slice %121 {offsets = [0, 64], sizes = [8, 64], strides = [1, 1]} : vector<8x256xf32> to vector<8x64xf32>
    %124 = vector.extract_strided_slice %121 {offsets = [0, 128], sizes = [8, 64], strides = [1, 1]} : vector<8x256xf32> to vector<8x64xf32>
    %125 = vector.extract_strided_slice %121 {offsets = [0, 192], sizes = [8, 64], strides = [1, 1]} : vector<8x256xf32> to vector<8x64xf32>
    %126 = arith.mulf %123, %91 : vector<8x64xf32>
    %127 = arith.mulf %122, %125 : vector<8x64xf32>
    %128 = arith.addf %126, %127 : vector<8x64xf32>
    %129 = math.tanh %128 : vector<8x64xf32>
    %130 = arith.mulf %124, %129 : vector<8x64xf32>
    %131 = vector.extract_strided_slice %6 {offsets = [24, 0], sizes = [8, 256], strides = [1, 1]} : vector<64x256xf32> to vector<8x256xf32>
    %cst_39 = arith.constant dense<0.000000e+00> : vector<8x256xf32>
    %132 = tpu.matmul %111, %7, %cst_39 {dimension_numbers = #tpu.dot_dimension_numbers<[1], [0], [0], [1], [0, 0, 1, 1], [], []>} : vector<8x64xf32>, vector<64x256xf32>, vector<8x256xf32> -> vector<8x256xf32>
    %133 = arith.addf %131, %132 : vector<8x256xf32>
    %134 = math.tanh %133 : vector<8x256xf32>
    %cst_40 = arith.constant 5.000000e-01 : f32
    %135 = vector.broadcast %cst_40 : f32 to vector<8x256xf32>
    %136 = arith.mulf %135, %134 : vector<8x256xf32>
    %cst_41 = arith.constant 5.000000e-01 : f32
    %137 = vector.broadcast %cst_41 : f32 to vector<8x256xf32>
    %138 = arith.addf %136, %137 : vector<8x256xf32>
    %139 = arith.select %15, %138, %134 : vector<8x256xi1>, vector<8x256xf32>
    %140 = vector.extract_strided_slice %139 {offsets = [0, 0], sizes = [8, 64], strides = [1, 1]} : vector<8x256xf32> to vector<8x64xf32>
    %141 = vector.extract_strided_slice %139 {offsets = [0, 64], sizes = [8, 64], strides = [1, 1]} : vector<8x256xf32> to vector<8x64xf32>
    %142 = vector.extract_strided_slice %139 {offsets = [0, 128], sizes = [8, 64], strides = [1, 1]} : vector<8x256xf32> to vector<8x64xf32>
    %143 = vector.extract_strided_slice %139 {offsets = [0, 192], sizes = [8, 64], strides = [1, 1]} : vector<8x256xf32> to vector<8x64xf32>
    %144 = arith.mulf %141, %109 : vector<8x64xf32>
    %145 = arith.mulf %140, %143 : vector<8x64xf32>
    %146 = arith.addf %144, %145 : vector<8x64xf32>
    %147 = math.tanh %146 : vector<8x64xf32>
    %148 = arith.mulf %142, %147 : vector<8x64xf32>
    %cst_42 = arith.constant dense<0.000000e+00> : vector<8x256xf32>
    %149 = tpu.matmul %148, %8, %cst_42 {dimension_numbers = #tpu.dot_dimension_numbers<[1], [0], [0], [1], [0, 0, 1, 1], [], []>} : vector<8x64xf32>, vector<64x256xf32>, vector<8x256xf32> -> vector<8x256xf32>
    %cst_43 = arith.constant dense<0.000000e+00> : vector<8x256xf32>
    %150 = tpu.matmul %130, %9, %cst_43 {dimension_numbers = #tpu.dot_dimension_numbers<[1], [0], [0], [1], [0, 0, 1, 1], [], []>} : vector<8x64xf32>, vector<64x256xf32>, vector<8x256xf32> -> vector<8x256xf32>
    %151 = arith.addf %149, %150 : vector<8x256xf32>
    %152 = arith.addf %151, %12 : vector<8x256xf32>
    %153 = math.tanh %152 : vector<8x256xf32>
    %cst_44 = arith.constant 5.000000e-01 : f32
    %154 = vector.broadcast %cst_44 : f32 to vector<8x256xf32>
    %155 = arith.mulf %154, %153 : vector<8x256xf32>
    %cst_45 = arith.constant 5.000000e-01 : f32
    %156 = vector.broadcast %cst_45 : f32 to vector<8x256xf32>
    %157 = arith.addf %155, %156 : vector<8x256xf32>
    %158 = arith.select %15, %157, %153 : vector<8x256xi1>, vector<8x256xf32>
    %159 = vector.extract_strided_slice %158 {offsets = [0, 0], sizes = [8, 64], strides = [1, 1]} : vector<8x256xf32> to vector<8x64xf32>
    %160 = vector.extract_strided_slice %158 {offsets = [0, 64], sizes = [8, 64], strides = [1, 1]} : vector<8x256xf32> to vector<8x64xf32>
    %161 = vector.extract_strided_slice %158 {offsets = [0, 128], sizes = [8, 64], strides = [1, 1]} : vector<8x256xf32> to vector<8x64xf32>
    %162 = vector.extract_strided_slice %158 {offsets = [0, 192], sizes = [8, 64], strides = [1, 1]} : vector<8x256xf32> to vector<8x64xf32>
    %163 = arith.mulf %160, %128 : vector<8x64xf32>
    %164 = arith.mulf %159, %162 : vector<8x64xf32>
    %165 = arith.addf %163, %164 : vector<8x64xf32>
    %166 = math.tanh %165 : vector<8x64xf32>
    %167 = arith.mulf %161, %166 : vector<8x64xf32>
    %168 = vector.extract_strided_slice %6 {offsets = [32, 0], sizes = [8, 256], strides = [1, 1]} : vector<64x256xf32> to vector<8x256xf32>
    %cst_46 = arith.constant dense<0.000000e+00> : vector<8x256xf32>
    %169 = tpu.matmul %148, %7, %cst_46 {dimension_numbers = #tpu.dot_dimension_numbers<[1], [0], [0], [1], [0, 0, 1, 1], [], []>} : vector<8x64xf32>, vector<64x256xf32>, vector<8x256xf32> -> vector<8x256xf32>
    %170 = arith.addf %168, %169 : vector<8x256xf32>
    %171 = math.tanh %170 : vector<8x256xf32>
    %cst_47 = arith.constant 5.000000e-01 : f32
    %172 = vector.broadcast %cst_47 : f32 to vector<8x256xf32>
    %173 = arith.mulf %172, %171 : vector<8x256xf32>
    %cst_48 = arith.constant 5.000000e-01 : f32
    %174 = vector.broadcast %cst_48 : f32 to vector<8x256xf32>
    %175 = arith.addf %173, %174 : vector<8x256xf32>
    %176 = arith.select %15, %175, %171 : vector<8x256xi1>, vector<8x256xf32>
    %177 = vector.extract_strided_slice %176 {offsets = [0, 0], sizes = [8, 64], strides = [1, 1]} : vector<8x256xf32> to vector<8x64xf32>
    %178 = vector.extract_strided_slice %176 {offsets = [0, 64], sizes = [8, 64], strides = [1, 1]} : vector<8x256xf32> to vector<8x64xf32>
    %179 = vector.extract_strided_slice %176 {offsets = [0, 128], sizes = [8, 64], strides = [1, 1]} : vector<8x256xf32> to vector<8x64xf32>
    %180 = vector.extract_strided_slice %176 {offsets = [0, 192], sizes = [8, 64], strides = [1, 1]} : vector<8x256xf32> to vector<8x64xf32>
    %181 = arith.mulf %178, %146 : vector<8x64xf32>
    %182 = arith.mulf %177, %180 : vector<8x64xf32>
    %183 = arith.addf %181, %182 : vector<8x64xf32>
    %184 = math.tanh %183 : vector<8x64xf32>
    %185 = arith.mulf %179, %184 : vector<8x64xf32>
    %cst_49 = arith.constant dense<0.000000e+00> : vector<8x256xf32>
    %186 = tpu.matmul %185, %8, %cst_49 {dimension_numbers = #tpu.dot_dimension_numbers<[1], [0], [0], [1], [0, 0, 1, 1], [], []>} : vector<8x64xf32>, vector<64x256xf32>, vector<8x256xf32> -> vector<8x256xf32>
    %cst_50 = arith.constant dense<0.000000e+00> : vector<8x256xf32>
    %187 = tpu.matmul %167, %9, %cst_50 {dimension_numbers = #tpu.dot_dimension_numbers<[1], [0], [0], [1], [0, 0, 1, 1], [], []>} : vector<8x64xf32>, vector<64x256xf32>, vector<8x256xf32> -> vector<8x256xf32>
    %188 = arith.addf %186, %187 : vector<8x256xf32>
    %189 = arith.addf %188, %12 : vector<8x256xf32>
    %190 = math.tanh %189 : vector<8x256xf32>
    %cst_51 = arith.constant 5.000000e-01 : f32
    %191 = vector.broadcast %cst_51 : f32 to vector<8x256xf32>
    %192 = arith.mulf %191, %190 : vector<8x256xf32>
    %cst_52 = arith.constant 5.000000e-01 : f32
    %193 = vector.broadcast %cst_52 : f32 to vector<8x256xf32>
    %194 = arith.addf %192, %193 : vector<8x256xf32>
    %195 = arith.select %15, %194, %190 : vector<8x256xi1>, vector<8x256xf32>
    %196 = vector.extract_strided_slice %195 {offsets = [0, 0], sizes = [8, 64], strides = [1, 1]} : vector<8x256xf32> to vector<8x64xf32>
    %197 = vector.extract_strided_slice %195 {offsets = [0, 64], sizes = [8, 64], strides = [1, 1]} : vector<8x256xf32> to vector<8x64xf32>
    %198 = vector.extract_strided_slice %195 {offsets = [0, 128], sizes = [8, 64], strides = [1, 1]} : vector<8x256xf32> to vector<8x64xf32>
    %199 = vector.extract_strided_slice %195 {offsets = [0, 192], sizes = [8, 64], strides = [1, 1]} : vector<8x256xf32> to vector<8x64xf32>
    %200 = arith.mulf %197, %165 : vector<8x64xf32>
    %201 = arith.mulf %196, %199 : vector<8x64xf32>
    %202 = arith.addf %200, %201 : vector<8x64xf32>
    %203 = math.tanh %202 : vector<8x64xf32>
    %204 = arith.mulf %198, %203 : vector<8x64xf32>
    %205 = vector.extract_strided_slice %6 {offsets = [40, 0], sizes = [8, 256], strides = [1, 1]} : vector<64x256xf32> to vector<8x256xf32>
    %cst_53 = arith.constant dense<0.000000e+00> : vector<8x256xf32>
    %206 = tpu.matmul %185, %7, %cst_53 {dimension_numbers = #tpu.dot_dimension_numbers<[1], [0], [0], [1], [0, 0, 1, 1], [], []>} : vector<8x64xf32>, vector<64x256xf32>, vector<8x256xf32> -> vector<8x256xf32>
    %207 = arith.addf %205, %206 : vector<8x256xf32>
    %208 = math.tanh %207 : vector<8x256xf32>
    %cst_54 = arith.constant 5.000000e-01 : f32
    %209 = vector.broadcast %cst_54 : f32 to vector<8x256xf32>
    %210 = arith.mulf %209, %208 : vector<8x256xf32>
    %cst_55 = arith.constant 5.000000e-01 : f32
    %211 = vector.broadcast %cst_55 : f32 to vector<8x256xf32>
    %212 = arith.addf %210, %211 : vector<8x256xf32>
    %213 = arith.select %15, %212, %208 : vector<8x256xi1>, vector<8x256xf32>
    %214 = vector.extract_strided_slice %213 {offsets = [0, 0], sizes = [8, 64], strides = [1, 1]} : vector<8x256xf32> to vector<8x64xf32>
    %215 = vector.extract_strided_slice %213 {offsets = [0, 64], sizes = [8, 64], strides = [1, 1]} : vector<8x256xf32> to vector<8x64xf32>
    %216 = vector.extract_strided_slice %213 {offsets = [0, 128], sizes = [8, 64], strides = [1, 1]} : vector<8x256xf32> to vector<8x64xf32>
    %217 = vector.extract_strided_slice %213 {offsets = [0, 192], sizes = [8, 64], strides = [1, 1]} : vector<8x256xf32> to vector<8x64xf32>
    %218 = arith.mulf %215, %183 : vector<8x64xf32>
    %219 = arith.mulf %214, %217 : vector<8x64xf32>
    %220 = arith.addf %218, %219 : vector<8x64xf32>
    %221 = math.tanh %220 : vector<8x64xf32>
    %222 = arith.mulf %216, %221 : vector<8x64xf32>
    %cst_56 = arith.constant dense<0.000000e+00> : vector<8x256xf32>
    %223 = tpu.matmul %222, %8, %cst_56 {dimension_numbers = #tpu.dot_dimension_numbers<[1], [0], [0], [1], [0, 0, 1, 1], [], []>} : vector<8x64xf32>, vector<64x256xf32>, vector<8x256xf32> -> vector<8x256xf32>
    %cst_57 = arith.constant dense<0.000000e+00> : vector<8x256xf32>
    %224 = tpu.matmul %204, %9, %cst_57 {dimension_numbers = #tpu.dot_dimension_numbers<[1], [0], [0], [1], [0, 0, 1, 1], [], []>} : vector<8x64xf32>, vector<64x256xf32>, vector<8x256xf32> -> vector<8x256xf32>
    %225 = arith.addf %223, %224 : vector<8x256xf32>
    %226 = arith.addf %225, %12 : vector<8x256xf32>
    %227 = math.tanh %226 : vector<8x256xf32>
    %cst_58 = arith.constant 5.000000e-01 : f32
    %228 = vector.broadcast %cst_58 : f32 to vector<8x256xf32>
    %229 = arith.mulf %228, %227 : vector<8x256xf32>
    %cst_59 = arith.constant 5.000000e-01 : f32
    %230 = vector.broadcast %cst_59 : f32 to vector<8x256xf32>
    %231 = arith.addf %229, %230 : vector<8x256xf32>
    %232 = arith.select %15, %231, %227 : vector<8x256xi1>, vector<8x256xf32>
    %233 = vector.extract_strided_slice %232 {offsets = [0, 0], sizes = [8, 64], strides = [1, 1]} : vector<8x256xf32> to vector<8x64xf32>
    %234 = vector.extract_strided_slice %232 {offsets = [0, 64], sizes = [8, 64], strides = [1, 1]} : vector<8x256xf32> to vector<8x64xf32>
    %235 = vector.extract_strided_slice %232 {offsets = [0, 128], sizes = [8, 64], strides = [1, 1]} : vector<8x256xf32> to vector<8x64xf32>
    %236 = vector.extract_strided_slice %232 {offsets = [0, 192], sizes = [8, 64], strides = [1, 1]} : vector<8x256xf32> to vector<8x64xf32>
    %237 = arith.mulf %234, %202 : vector<8x64xf32>
    %238 = arith.mulf %233, %236 : vector<8x64xf32>
    %239 = arith.addf %237, %238 : vector<8x64xf32>
    %240 = math.tanh %239 : vector<8x64xf32>
    %241 = arith.mulf %235, %240 : vector<8x64xf32>
    %242 = vector.extract_strided_slice %6 {offsets = [48, 0], sizes = [8, 256], strides = [1, 1]} : vector<64x256xf32> to vector<8x256xf32>
    %cst_60 = arith.constant dense<0.000000e+00> : vector<8x256xf32>
    %243 = tpu.matmul %222, %7, %cst_60 {dimension_numbers = #tpu.dot_dimension_numbers<[1], [0], [0], [1], [0, 0, 1, 1], [], []>} : vector<8x64xf32>, vector<64x256xf32>, vector<8x256xf32> -> vector<8x256xf32>
    %244 = arith.addf %242, %243 : vector<8x256xf32>
    %245 = math.tanh %244 : vector<8x256xf32>
    %cst_61 = arith.constant 5.000000e-01 : f32
    %246 = vector.broadcast %cst_61 : f32 to vector<8x256xf32>
    %247 = arith.mulf %246, %245 : vector<8x256xf32>
    %cst_62 = arith.constant 5.000000e-01 : f32
    %248 = vector.broadcast %cst_62 : f32 to vector<8x256xf32>
    %249 = arith.addf %247, %248 : vector<8x256xf32>
    %250 = arith.select %15, %249, %245 : vector<8x256xi1>, vector<8x256xf32>
    %251 = vector.extract_strided_slice %250 {offsets = [0, 0], sizes = [8, 64], strides = [1, 1]} : vector<8x256xf32> to vector<8x64xf32>
    %252 = vector.extract_strided_slice %250 {offsets = [0, 64], sizes = [8, 64], strides = [1, 1]} : vector<8x256xf32> to vector<8x64xf32>
    %253 = vector.extract_strided_slice %250 {offsets = [0, 128], sizes = [8, 64], strides = [1, 1]} : vector<8x256xf32> to vector<8x64xf32>
    %254 = vector.extract_strided_slice %250 {offsets = [0, 192], sizes = [8, 64], strides = [1, 1]} : vector<8x256xf32> to vector<8x64xf32>
    %255 = arith.mulf %252, %220 : vector<8x64xf32>
    %256 = arith.mulf %251, %254 : vector<8x64xf32>
    %257 = arith.addf %255, %256 : vector<8x64xf32>
    %258 = math.tanh %257 : vector<8x64xf32>
    %259 = arith.mulf %253, %258 : vector<8x64xf32>
    %cst_63 = arith.constant dense<0.000000e+00> : vector<8x256xf32>
    %260 = tpu.matmul %259, %8, %cst_63 {dimension_numbers = #tpu.dot_dimension_numbers<[1], [0], [0], [1], [0, 0, 1, 1], [], []>} : vector<8x64xf32>, vector<64x256xf32>, vector<8x256xf32> -> vector<8x256xf32>
    %cst_64 = arith.constant dense<0.000000e+00> : vector<8x256xf32>
    %261 = tpu.matmul %241, %9, %cst_64 {dimension_numbers = #tpu.dot_dimension_numbers<[1], [0], [0], [1], [0, 0, 1, 1], [], []>} : vector<8x64xf32>, vector<64x256xf32>, vector<8x256xf32> -> vector<8x256xf32>
    %262 = arith.addf %260, %261 : vector<8x256xf32>
    %263 = arith.addf %262, %12 : vector<8x256xf32>
    %264 = math.tanh %263 : vector<8x256xf32>
    %cst_65 = arith.constant 5.000000e-01 : f32
    %265 = vector.broadcast %cst_65 : f32 to vector<8x256xf32>
    %266 = arith.mulf %265, %264 : vector<8x256xf32>
    %cst_66 = arith.constant 5.000000e-01 : f32
    %267 = vector.broadcast %cst_66 : f32 to vector<8x256xf32>
    %268 = arith.addf %266, %267 : vector<8x256xf32>
    %269 = arith.select %15, %268, %264 : vector<8x256xi1>, vector<8x256xf32>
    %270 = vector.extract_strided_slice %269 {offsets = [0, 0], sizes = [8, 64], strides = [1, 1]} : vector<8x256xf32> to vector<8x64xf32>
    %271 = vector.extract_strided_slice %269 {offsets = [0, 64], sizes = [8, 64], strides = [1, 1]} : vector<8x256xf32> to vector<8x64xf32>
    %272 = vector.extract_strided_slice %269 {offsets = [0, 128], sizes = [8, 64], strides = [1, 1]} : vector<8x256xf32> to vector<8x64xf32>
    %273 = vector.extract_strided_slice %269 {offsets = [0, 192], sizes = [8, 64], strides = [1, 1]} : vector<8x256xf32> to vector<8x64xf32>
    %274 = arith.mulf %271, %239 : vector<8x64xf32>
    %275 = arith.mulf %270, %273 : vector<8x64xf32>
    %276 = arith.addf %274, %275 : vector<8x64xf32>
    %277 = math.tanh %276 : vector<8x64xf32>
    %278 = arith.mulf %272, %277 : vector<8x64xf32>
    %279 = vector.extract_strided_slice %6 {offsets = [56, 0], sizes = [8, 256], strides = [1, 1]} : vector<64x256xf32> to vector<8x256xf32>
    %cst_67 = arith.constant dense<0.000000e+00> : vector<8x256xf32>
    %280 = tpu.matmul %259, %7, %cst_67 {dimension_numbers = #tpu.dot_dimension_numbers<[1], [0], [0], [1], [0, 0, 1, 1], [], []>} : vector<8x64xf32>, vector<64x256xf32>, vector<8x256xf32> -> vector<8x256xf32>
    %281 = arith.addf %279, %280 : vector<8x256xf32>
    %282 = math.tanh %281 : vector<8x256xf32>
    %cst_68 = arith.constant 5.000000e-01 : f32
    %283 = vector.broadcast %cst_68 : f32 to vector<8x256xf32>
    %284 = arith.mulf %283, %282 : vector<8x256xf32>
    %cst_69 = arith.constant 5.000000e-01 : f32
    %285 = vector.broadcast %cst_69 : f32 to vector<8x256xf32>
    %286 = arith.addf %284, %285 : vector<8x256xf32>
    %287 = arith.select %15, %286, %282 : vector<8x256xi1>, vector<8x256xf32>
    %288 = vector.extract_strided_slice %287 {offsets = [0, 0], sizes = [8, 64], strides = [1, 1]} : vector<8x256xf32> to vector<8x64xf32>
    %289 = vector.extract_strided_slice %287 {offsets = [0, 64], sizes = [8, 64], strides = [1, 1]} : vector<8x256xf32> to vector<8x64xf32>
    %290 = vector.extract_strided_slice %287 {offsets = [0, 128], sizes = [8, 64], strides = [1, 1]} : vector<8x256xf32> to vector<8x64xf32>
    %291 = vector.extract_strided_slice %287 {offsets = [0, 192], sizes = [8, 64], strides = [1, 1]} : vector<8x256xf32> to vector<8x64xf32>
    %292 = arith.mulf %289, %257 : vector<8x64xf32>
    %293 = arith.mulf %288, %291 : vector<8x64xf32>
    %294 = arith.addf %292, %293 : vector<8x64xf32>
    %295 = math.tanh %294 : vector<8x64xf32>
    %296 = arith.mulf %290, %295 : vector<8x64xf32>
    %cst_70 = arith.constant dense<0.000000e+00> : vector<8x256xf32>
    %297 = tpu.matmul %296, %8, %cst_70 {dimension_numbers = #tpu.dot_dimension_numbers<[1], [0], [0], [1], [0, 0, 1, 1], [], []>} : vector<8x64xf32>, vector<64x256xf32>, vector<8x256xf32> -> vector<8x256xf32>
    %cst_71 = arith.constant dense<0.000000e+00> : vector<8x256xf32>
    %298 = tpu.matmul %278, %9, %cst_71 {dimension_numbers = #tpu.dot_dimension_numbers<[1], [0], [0], [1], [0, 0, 1, 1], [], []>} : vector<8x64xf32>, vector<64x256xf32>, vector<8x256xf32> -> vector<8x256xf32>
    %299 = arith.addf %297, %298 : vector<8x256xf32>
    %300 = arith.addf %299, %12 : vector<8x256xf32>
    %301 = math.tanh %300 : vector<8x256xf32>
    %cst_72 = arith.constant 5.000000e-01 : f32
    %302 = vector.broadcast %cst_72 : f32 to vector<8x256xf32>
    %303 = arith.mulf %302, %301 : vector<8x256xf32>
    %cst_73 = arith.constant 5.000000e-01 : f32
    %304 = vector.broadcast %cst_73 : f32 to vector<8x256xf32>
    %305 = arith.addf %303, %304 : vector<8x256xf32>
    %306 = arith.select %15, %305, %301 : vector<8x256xi1>, vector<8x256xf32>
    %307 = vector.extract_strided_slice %306 {offsets = [0, 0], sizes = [8, 64], strides = [1, 1]} : vector<8x256xf32> to vector<8x64xf32>
    %308 = vector.extract_strided_slice %306 {offsets = [0, 64], sizes = [8, 64], strides = [1, 1]} : vector<8x256xf32> to vector<8x64xf32>
    %309 = vector.extract_strided_slice %306 {offsets = [0, 128], sizes = [8, 64], strides = [1, 1]} : vector<8x256xf32> to vector<8x64xf32>
    %310 = vector.extract_strided_slice %306 {offsets = [0, 192], sizes = [8, 64], strides = [1, 1]} : vector<8x256xf32> to vector<8x64xf32>
    %311 = arith.mulf %308, %276 : vector<8x64xf32>
    %312 = arith.mulf %307, %310 : vector<8x64xf32>
    %313 = arith.addf %311, %312 : vector<8x64xf32>
    %314 = math.tanh %313 : vector<8x64xf32>
    %315 = arith.mulf %309, %314 : vector<8x64xf32>
    %c0_74 = arith.constant 0 : index
    %c0_75 = arith.constant 0 : index
    %316 = vector.load %arg8[%c0_74, %c0_75] : memref<64x4xf32, #tpu.memory_space<vmem>>, vector<64x4xf32>
    %cst_76 = arith.constant dense<0.000000e+00> : vector<8x4xf32>
    %317 = tpu.matmul %315, %316, %cst_76 {dimension_numbers = #tpu.dot_dimension_numbers<[1], [0], [0], [1], [0, 0, 1, 1], [], []>} : vector<8x64xf32>, vector<64x4xf32>, vector<8x4xf32> -> vector<8x4xf32>
    %c0_77 = arith.constant 0 : index
    %c0_78 = arith.constant 0 : index
    %318 = vector.load %arg9[%c0_77, %c0_78] : memref<1x4xf32, #tpu.memory_space<vmem>>, vector<1x4xf32>
    %319 = vector.broadcast %318 : vector<1x4xf32> to vector<8x4xf32>
    %320 = arith.addf %317, %319 : vector<8x4xf32>
    %c0_79 = arith.constant 0 : index
    %c0_80 = arith.constant 0 : index
    %321 = vector.load %arg10[%c0_79, %c0_80] : memref<8x4xf32, #tpu.memory_space<vmem>>, vector<8x4xf32>
    tpu.vector_store %arg10[%c0_79, %c0_80], %320 {strides = array<i32>} : memref<8x4xf32, #tpu.memory_space<vmem>>, vector<8x4xf32>,
    return
  }
  func.func @transform_0(%arg0: i32) -> (i32, i32, i32) {
    %c0_i32 = arith.constant 0 : i32
    %c0_i32_0 = arith.constant 0 : i32
    %c0_i32_1 = arith.constant 0 : i32
    return %c0_i32, %arg0, %c0_i32_0 : i32, i32, i32
  }
  func.func @transform_1(%arg0: i32) -> (i32, i32) {
    %c0_i32 = arith.constant 0 : i32
    %c0_i32_0 = arith.constant 0 : i32
    %c0_i32_1 = arith.constant 0 : i32
    return %c0_i32, %c0_i32_0 : i32, i32
  }
  func.func @transform_2(%arg0: i32) -> (i32, i32) {
    %c0_i32 = arith.constant 0 : i32
    %c0_i32_0 = arith.constant 0 : i32
    %c0_i32_1 = arith.constant 0 : i32
    return %c0_i32, %c0_i32_0 : i32, i32
  }
  func.func @transform_3(%arg0: i32) -> (i32, i32) {
    %c0_i32 = arith.constant 0 : i32
    %c0_i32_0 = arith.constant 0 : i32
    %c0_i32_1 = arith.constant 0 : i32
    return %c0_i32, %c0_i32_0 : i32, i32
  }
  func.func @transform_4(%arg0: i32) -> (i32, i32) {
    %c0_i32 = arith.constant 0 : i32
    %c0_i32_0 = arith.constant 0 : i32
    %c0_i32_1 = arith.constant 0 : i32
    return %c0_i32, %c0_i32_0 : i32, i32
  }
  func.func @transform_5(%arg0: i32) -> (i32, i32) {
    %c0_i32 = arith.constant 0 : i32
    %c0_i32_0 = arith.constant 0 : i32
    %c0_i32_1 = arith.constant 0 : i32
    return %c0_i32, %c0_i32_0 : i32, i32
  }
  func.func @transform_6(%arg0: i32) -> (i32, i32) {
    %c0_i32 = arith.constant 0 : i32
    %c0_i32_0 = arith.constant 0 : i32
    %c0_i32_1 = arith.constant 0 : i32
    return %c0_i32, %c0_i32_0 : i32, i32
  }
  func.func @transform_7(%arg0: i32) -> (i32, i32) {
    %c0_i32 = arith.constant 0 : i32
    %c0_i32_0 = arith.constant 0 : i32
    %c0_i32_1 = arith.constant 0 : i32
    return %c0_i32, %c0_i32_0 : i32, i32
  }
  func.func @transform_8(%arg0: i32) -> (i32, i32) {
    %c0_i32 = arith.constant 0 : i32
    %c0_i32_0 = arith.constant 0 : i32
    %c0_i32_1 = arith.constant 0 : i32
    return %c0_i32, %c0_i32_0 : i32, i32
  }
  func.func @transform_9(%arg0: i32) -> (i32, i32) {
    %c0_i32 = arith.constant 0 : i32
    %c0_i32_0 = arith.constant 0 : i32
    return %arg0, %c0_i32 : i32, i32
  }
}

</mosaic_0001>

<bundles_post_ra>
// kernel: lstm_model_forward.1
= control target key start
LH: loop header
LB: loop body
LE: loop exit
PB: predicated region body
PF: predicated region fallthrough
CT: control target
= control target key end

     0   :  { %14 = vsyncpa [#allocation3], 0  ;;  %s3164_s0 = inlined_call_operand.vmem [shape: f32[8,8,8], index: 0, kind: input, shape index: {}]   ;;  %s3165_s1 = inlined_call_operand.hbm [shape: f32[8,256], index: 1, kind: input, shape index: {}]   ;;  %s3166_s2 = inlined_call_operand.vmem [shape: f32[64,256], index: 2, kind: input, shape index: {}]   ;;  %s3167_s3 = inlined_call_operand.vmem [shape: f32[1,256], index: 3, kind: input, shape index: {}]   ;;  %s3168_s4 = inlined_call_operand.vmem [shape: f32[64,256], index: 4, kind: input, shape index: {}]   ;;  %s3169_s5 = inlined_call_operand.hbm [shape: f32[64,256], index: 5, kind: input, shape index: {}]   ;;  %s3170_s6 = inlined_call_operand.vmem [shape: f32[1,256], index: 6, kind: input, shape index: {}]   ;;  %s3171_s7 = inlined_call_operand.vmem [shape: f32[64,4], index: 7, kind: input, shape index: {}]   ;;  %s3172_s8 = inlined_call_operand.vmem [shape: f32[1,4], index: 8, kind: input, shape index: {}]   ;;  %s3173_s9 = inlined_call_operand.vmem [shape: f32[8,4], index: 9, kind: output, shape index: {}]  }
   0x1   :  { %s23_s11 = sshll.u32 %s3165_s1, 4  ;;  %s24_s11 = int_to_ptr.hbm [resolvable:$true] %s23_s11 }
   0x2   :  { %15 = vsyncpa [#allocation5], 0  ;;  %s1992_s12 = smov [#allocation2]   ;;  %s39_s16 = sshll.u32 %s3169_s5, 4  ;;  %s40_s16 = int_to_ptr.hbm [resolvable:$true] %s39_s16 }
   0x3   :  { %s25_s13 = sshll.u32 %s1992_s12, 4  ;;  %s1993_s17 = smov [#allocation4]   ;;  %s26_s13 = int_to_ptr.vmem [resolvable:$true] %s25_s13 }
   0x4   :  { %28 = dma.hbm_to_vmem [thread:$0]  %s24_s11, 256, %s26_s13, [#allocation3]  }
   0x5   :  { %s41_s18 = sshll.u32 %s1993_s17, 4  ;;  %s1994_s19 = smov 256   ;;  %s42_s18 = int_to_ptr.vmem [resolvable:$true] %s41_s18 }
   0x6   :  { %s1995_s20 = smov 16  }
   0x7   :  { %47 = dma.hbm_to_vmem [thread:$0]  %s40_s16, 2048, %s42_s18, [#allocation5], %s1994_s19, %s1994_s19, %s1995_s20  }
   0x8   :  { %1988 = dma.done.wait [#allocation3], 256  }
   0x9   :  { %1989 = vsyncadd [#allocation3], 4294967040 }
   0xa   :  { %1990 = dma.done.wait [#allocation5], 2048  }
   0xb   :  { %1991 = vsyncadd [#allocation5], 4294965248  ;;  %v2057_v0 = vld [vmem:[%s3166_s2 + $0x78] sm:$0xff]  ;;  %v2062_v1 = vld [vmem:[%s3166_s2 + $0x68] sm:$0xff]  ;;  %vm78_vm0 = vcmask 64512   ;;  %v1996_v19 = vmov 0.0   ;;  %v239_v24 = vlaneseq }
   0xc   :  { %276 = vmatpush.msra.mxu3 %v2057_v0  ;;  %v2068_v2 = vld [vmem:[%s3166_s2 + $0x58] sm:$0xff]  ;;  %v71_v3 = vld [vmem:[#allocation2 + $0x8] sm:$0xff]  ;;  %v62_v4 = vld [vmem:[%s3164_s0] sm:$0xff]  ;;  %vm244_vm2 = vcmask 523264   ;;  %vm1720_vm3 = vcmask 31744  }
   0xd   :  { %159 = vmatpush.msra.mxu1 %v71_v3  ;;  %v2077_v5 = vld [vmem:[%s3166_s2 + $0x70] sm:$0xff]  ;;  %v2082_v6 = vld [vmem:[%s3166_s2 + $0x60] sm:$0xff]  ;;  %v2087_v7 = vld [vmem:[%s3166_s2 + $0x48] sm:$0xff]  ;;  %v240_v27 = vand.u32 127, %v239_v24 }
   0xe   :  { %277 = vmatpush.msra.mxu3 %v2062_v1  ;;  %1736 = vmatmul.msk.f32.vlgmr.msra.gmra.mxu1 %vm78_vm0, %v62_v4  ;;  %v2095_v8 = vld [vmem:[%s3166_s2 + $0x50] sm:$0xff]  ;;  %v2100_v9 = vld [vmem:[%s3166_s2 + $0x38] sm:$0xff]  ;;  %v70_v10 = vld [vmem:[#allocation2] sm:$0xff] }
   0xf   :  { %256 = vmatpush.msra.mxu2 %v2077_v5  ;;  %v2107_v11 = vld [vmem:[%s3166_s2 + $0x40] sm:$0xff]  ;;  %118 = vmatpush.msra.mxu0 %v70_v10  ;;  %v2112_v12 = vld [vmem:[%s3166_s2 + $0x28] sm:$0xff]  ;;  %v2120_v13 = vld [vmem:[%s3166_s2 + $0x30] sm:$0xff]  ;;  %v2163_v28 = vadd.s32 128, %v240_v27 }
  0x10   :  { %278 = vmatpush.msra.mxu3 %v2068_v2  ;;  %1728 = vmatmul.msk.f32.vlgmr.msra.gmra.mxu0 %vm78_vm0, %v62_v4  ;;  %v2125_v14 = vld [vmem:[%s3166_s2 + $0x18] sm:$0xff]  ;;  %v2132_v15 = vld [vmem:[%s3166_s2 + $0x20] sm:$0xff]  ;;  %v2137_v16 = vld [vmem:[%s3166_s2 + $0x8] sm:$0xff] }
  0x11   :  { %257 = vmatpush.msra.mxu2 %v2082_v6  ;;  %3208 = vst [vmem:[#allocation8_spill] sm:$0xff] %v2137_v16  ;;  %v2144_v17 = vld [vmem:[%s3166_s2 + $0x10] sm:$0xff]  ;;  %v2151_v18 = vld [vmem:[%s3166_s2] sm:$0xff]  ;;  %vm243_vm1 = vcmp.lt.s32.totalorder %v2163_v28, 192  ;;  %v2181_v44 = vld [vmem:[#allocation4 + $0x78] sm:$0xff] }
  0x12   :  { %279 = vmatpush.msra.mxu3 %v2087_v7  ;;  %3209 = vst [vmem:[#allocation9_spill] sm:$0xff] %v2151_v18  ;;  %v72_v20 = vld [vmem:[%s3167_s3] sm:$0x3]  ;;  %s1997_s3 = smov 64   ;;  %v2183_v45 = vld [vmem:[#allocation4 + $0x60] sm:$0xff]  ;;  %v2187_v46 = vld [vmem:[#allocation4 + $0x68] sm:$0xff]  ;;  %523 = vmatpush.msrb.mxu1 %v2181_v44 }
  0x13   :  { %258 = vmatpush.msra.mxu2 %v2095_v8  ;;  %v2160_v21 = vperm.slane %v72_v20, 1  ;;  %3211 = vst [vmem:[#allocation11_spill] sm:$0xff] %v2163_v28  ;;  %v2172_v33 = vperm.slane %v72_v20, 0  ;;  %v2179_v43 = vld [vmem:[#allocation4 + $0x70] sm:$0xff]  ;;  %v2191_v48 = vld [vmem:[#allocation4 + $0x58] sm:$0xff]  ;;  %v2197_v49 = vld [vmem:[#allocation4 + $0x40] sm:$0xff] }
  0x14   :  { %280 = vmatpush.msra.mxu3 %v2100_v9  ;;  %v2189_v47 = vld [vmem:[#allocation4 + $0x50] sm:$0xff]  ;;  %503 = vmatpush.msrb.mxu0 %v2179_v43  ;;  %v2199_v50 = vld [vmem:[#allocation4 + $0x48] sm:$0xff]  ;;  %v2207_v52 = vld [vmem:[#allocation4 + $0x38] sm:$0xff] }
  0x15   :  { %259 = vmatpush.msra.mxu2 %v2107_v11  ;;  %3210 = vst [vmem:[#allocation10_spill] sm:$0xff] %v2160_v21  ;;  %524 = vmatpush.msrb.mxu1 %v2187_v46  ;;  %v2205_v51 = vld [vmem:[#allocation4 + $0x30] sm:$0xff]  ;;  %v2213_v53 = vld [vmem:[#allocation4 + $0x20] sm:$0xff]  ;;  %v2215_v54 = vld [vmem:[#allocation4 + $0x28] sm:$0xff] }
  0x16   :  { %281 = vmatpush.msra.mxu3 %v2112_v12  ;;  %504 = vmatpush.msrb.mxu0 %v2183_v45  ;;  %3212 = vst [vmem:[#allocation12_spill] sm:$0xff] %v2207_v52  ;;  %v2221_v55 = vld [vmem:[#allocation4 + $0x10] sm:$0xff]  ;;  %v2223_v56 = vld [vmem:[#allocation4 + $0x18] sm:$0xff]  ;;  %v2229_v57 = vld [vmem:[#allocation4] sm:$0xff] }
  0x17   :  { %260 = vmatpush.msra.mxu2 %v2120_v13  ;;  %525 = vmatpush.msrb.mxu1 %v2191_v48  ;;  %3213 = vst [vmem:[#allocation13_spill] sm:$0xff] %v2213_v53  ;;  %v2231_v58 = vld [vmem:[#allocation4 + $0x8] sm:$0xff]  ;;  %v2240_v59 = vld [vmem:[%s3168_s4 + $0x70] sm:$0xff]  ;;  %v2254_v61 = vld [vmem:[%s3168_s4 + $0x60] sm:$0xff] }
  0x18   :  { %282 = vmatpush.msra.mxu3 %v2125_v14  ;;  %505 = vmatpush.msrb.mxu0 %v2189_v47  ;;  %3214 = vst [vmem:[#allocation14_spill] sm:$0xff] %v2215_v54  ;;  %v2245_v60 = vld [vmem:[%s3168_s4 + $0x78] sm:$0xff]  ;;  %v2259_v62 = vld [vmem:[%s3168_s4 + $0x68] sm:$0xff]  ;;  %v2266_v63 = vld [vmem:[%s3168_s4 + $0x50] sm:$0xff] }
  0x19   :  { %261 = vmatpush.msra.mxu2 %v2132_v15  ;;  %526 = vmatpush.msrb.mxu1 %v2199_v50  ;;  %3215 = vst [vmem:[#allocation15_spill] sm:$0xff] %v2221_v55  ;;  %v2271_v3 = vld [vmem:[%s3168_s4 + $0x58] sm:$0xff]  ;;  %v2280_v4 = vld [vmem:[%s3168_s4 + $0x40] sm:$0xff]  ;;  %v2285_v10 = vld [vmem:[%s3168_s4 + $0x48] sm:$0xff] }
  0x1a   :  { %283 = vmatpush.msra.mxu3 %v2137_v16  ;;  %506 = vmatpush.msrb.mxu0 %v2197_v49  ;;  %3216 = vst [vmem:[#allocation16_spill] sm:$0xff] %v2223_v56  ;;  %v2295_v20 = vld [vmem:[%s3168_s4 + $0x30] sm:$0xff] }
  0x1b   :  { %284 = vmatmul.f32.vlgmr.msra.gmra.mxu3 %v1996_v19  ;;  %262 = vmatpush.msra.mxu2 %v2144_v17  ;;  %3217 = vst [vmem:[#allocation17_spill] sm:$0xff] %v2229_v57  ;;  %v2326_v27 = vld [vmem:[%s3168_s4 + $0x10] sm:$0xff] }
  0x1c   :  { %343 = vmatpush.msrb.mxu3 %v2181_v44  ;;  %507 = vmatpush.msrb.mxu0 %v2205_v51  ;;  %3218 = vst [vmem:[#allocation18_spill] sm:$0xff] %v2231_v58 }
  0x1d   :  { %263 = vmatpush.msra.mxu2 %v2151_v18  ;;  %527 = vmatpush.msrb.mxu1 %v2207_v52 }
  0x1e   :  { %264 = vmatmul.f32.vlgmr.msra.gmra.mxu2 %v1996_v19  ;;  %344 = vmatpush.msrb.mxu3 %v2187_v46 }
  0x1f   :  { %323 = vmatpush.msrb.mxu2 %v2179_v43  ;;  %508 = vmatpush.msrb.mxu0 %v2213_v53 }
  0x20   :  { %345 = vmatpush.msrb.mxu3 %v2191_v48  ;;  %528 = vmatpush.msrb.mxu1 %v2215_v54 }
  0x21   :  { %324 = vmatpush.msrb.mxu2 %v2183_v45  ;;  %509 = vmatpush.msrb.mxu0 %v2221_v55 }
  0x22   :  { %346 = vmatpush.msrb.mxu3 %v2199_v50  ;;  %529 = vmatpush.msrb.mxu1 %v2223_v56 }
  0x23   :  { %325 = vmatpush.msrb.mxu2 %v2189_v47  ;;  %510 = vmatpush.msrb.mxu0 %v2229_v57 }
  0x24   :  { %347 = vmatpush.msrb.mxu3 %v2207_v52  ;;  %530 = vmatpush.msrb.mxu1 %v2231_v58 }
  0x25   :  { %326 = vmatpush.msrb.mxu2 %v2197_v49  ;;  %613 = vmatpush.msra.mxu0 %v2077_v5 }
  0x26   :  { %348 = vmatpush.msrb.mxu3 %v2215_v54  ;;  %633 = vmatpush.msra.mxu1 %v2057_v0 }
  0x27   :  { %327 = vmatpush.msrb.mxu2 %v2205_v51  ;;  %614 = vmatpush.msra.mxu0 %v2082_v6 }
  0x28   :  { %349 = vmatpush.msrb.mxu3 %v2223_v56  ;;  %634 = vmatpush.msra.mxu1 %v2062_v1 }
  0x29   :  { %328 = vmatpush.msrb.mxu2 %v2213_v53  ;;  %615 = vmatpush.msra.mxu0 %v2095_v8 }
  0x2a   :  { %350 = vmatpush.msrb.mxu3 %v2231_v58  ;;  %635 = vmatpush.msra.mxu1 %v2068_v2 }
  0x2b   :  { %329 = vmatpush.msrb.mxu2 %v2221_v55  ;;  %351 = vmatmul.f32.vlgmr.msrb.gmra.mxu3 %v1996_v19 }
  0x2c   :  { %386 = vmatpush.msra.mxu3 %v2245_v60  ;;  %616 = vmatpush.msra.mxu0 %v2107_v11 }
  0x2d   :  { %330 = vmatpush.msrb.mxu2 %v2229_v57  ;;  %636 = vmatpush.msra.mxu1 %v2087_v7 }
  0x2e   :  { %331 = vmatmul.f32.vlgmr.msrb.gmra.mxu2 %v1996_v19  ;;  %387 = vmatpush.msra.mxu3 %v2259_v62 }
  0x2f   :  { %366 = vmatpush.msra.mxu2 %v2240_v59  ;;  %617 = vmatpush.msra.mxu0 %v2120_v13 }
  0x30   :  { %388 = vmatpush.msra.mxu3 %v2271_v3  ;;  %637 = vmatpush.msra.mxu1 %v2100_v9 }
  0x31   :  { %367 = vmatpush.msra.mxu2 %v2254_v61  ;;  %618 = vmatpush.msra.mxu0 %v2132_v15 }
  0x32   :  { %389 = vmatpush.msra.mxu3 %v2285_v10  ;;  %638 = vmatpush.msra.mxu1 %v2112_v12 }
  0x33   :  { %368 = vmatpush.msra.mxu2 %v2266_v63  ;;  %619 = vmatpush.msra.mxu0 %v2144_v17 }
  0x34   :  { %639 = vmatpush.msra.mxu1 %v2125_v14 }
  0x35   :  { %369 = vmatpush.msra.mxu2 %v2280_v4  ;;  %620 = vmatpush.msra.mxu0 %v2151_v18 }
  0x36   :  { %640 = vmatpush.msra.mxu1 %v2137_v16 }
  0x37   :  { %370 = vmatpush.msra.mxu2 %v2295_v20 }
  0x8b   :  { %v161_v22 = vpop.f32.mrf.mxu1 }
  0x8c   :  { %v162_v23 = vadd.f32 %v161_v22, %v2160_v21  ;;  %v2300_v22 = vld [vmem:[%s3168_s4 + $0x38] sm:$0xff] }
  0x8d   :  { %v120_v34 = vpop.f32.mrf.mxu0  ;;  %390 = vmatpush.msra.mxu3 %v2300_v22 }
  0x8e   :  { %v121_v35 = vadd.f32 %v120_v34, %v2172_v33 }
  0x9e   :  { %v285_v25 = vpop.f32.mrf.mxu3 }
  0x9f   :  { %v289_v26 = vadd.f32 %v285_v25, %v162_v23  ;;  %v2311_v25 = vld [vmem:[%s3168_s4 + $0x20] sm:$0xff] }
  0xa0   :  { %371 = vmatpush.msra.mxu2 %v2311_v25 }
  0xa1   :  { %1796 = vtanh.f32 %v289_v26  ;;  %v265_v36 = vpop.f32.mrf.mxu2  ;;  %v2316_v26 = vld [vmem:[%s3168_s4 + $0x28] sm:$0xff] }
  0xa2   :  { %v288_v37 = vadd.f32 %v265_v36, %v121_v35  ;;  %391 = vmatpush.msra.mxu3 %v2316_v26  ;;  %372 = vmatpush.msra.mxu2 %v2326_v27  ;;  %v63_v35 = vld [vmem:[%s3164_s0 + $0x8] sm:$0xff] }
  0xa3   :  { %1729 = vmatmul.msk.f32.gmra.mxu0 %vm78_vm0, %v63_v35  ;;  %1737 = vmatmul.msk.f32.gmra.mxu1 %vm78_vm0, %v63_v35 }
  0xa4   :  { %1798 = vtanh.f32 %v288_v37 }
  0xa7   :  { %v1797_v29 = vpop.eup %1796 }
  0xa8   :  { %v293_v30 = vmul.f32 0.5, %v1797_v29 }
  0xaa   :  { %v295_v31 = vadd.f32 0.5, %v293_v30  ;;  %v1799_v38 = vpop.eup %1798  ;;  %v2340_v30 = vld [vmem:[%s3168_s4] sm:$0xff] }
  0xab   :  { %v292_v39 = vmul.f32 0.5, %v1799_v38  ;;  %373 = vmatpush.msra.mxu2 %v2340_v30  ;;  %v233_v38 = vld [vmem:[%s3170_s6] sm:$0x3] }
  0xac   :  { %v2168_v32 = vsel %vm243_vm1, %v295_v31, %v1797_v29  ;;  %v2331_v29 = vld [vmem:[%s3168_s4 + $0x18] sm:$0xff]  ;;  %v2345_v31 = vld [vmem:[%s3168_s4 + $0x8] sm:$0xff] }
  0xad   :  { %300 = vrot.lane.b32.xlu0 %v2168_v32, %s1997_s3  ;;  %v2175_v40 = vadd.f32 0.5, %v292_v39  ;;  %392 = vmatpush.msra.mxu3 %v2331_v29  ;;  %v2423_v39 = vperm.slane %v233_v38, 1 }
  0xae   :  { %433 = vmatpush.msrb.mxu2 %v2077_v5 }
  0xaf   :  { %v298_v19 = vmul.f32 0.0, %v2175_v40  ;;  %393 = vmatpush.msra.mxu3 %v2345_v31  ;;  %3219 = vst [vmem:[#allocation19_spill] sm:$0xff] %v2423_v39 }
  0xb0   :  { %434 = vmatpush.msrb.mxu2 %v2082_v6 }
  0xb1   :  { %453 = vmatpush.msrb.mxu3 %v2057_v0 }
  0xb2   :  { %435 = vmatpush.msrb.mxu2 %v2095_v8 }
  0xb3   :  { %454 = vmatpush.msrb.mxu3 %v2062_v1 }
  0xb4   :  { %436 = vmatpush.msrb.mxu2 %v2107_v11 }
  0xb5   :  { %455 = vmatpush.msrb.mxu3 %v2068_v2 }
  0xb6   :  { %437 = vmatpush.msrb.mxu2 %v2120_v13 }
  0xb7   :  { %456 = vmatpush.msrb.mxu3 %v2087_v7 }
  0xb8   :  { %438 = vmatpush.msrb.mxu2 %v2132_v15 }
  0xb9   :  { %457 = vmatpush.msrb.mxu3 %v2100_v9 }
  0xba   :  { %439 = vmatpush.msrb.mxu2 %v2144_v17 }
  0xbb   :  { %458 = vmatpush.msrb.mxu3 %v2112_v12 }
  0xbc   :  { %440 = vmatpush.msrb.mxu2 %v2151_v18 }
  0xbd   :  { %459 = vmatpush.msrb.mxu3 %v2125_v14 }
  0xbf   :  { %460 = vmatpush.msrb.mxu3 %v2137_v16 }
 0x11f   :  { %v301_v41 = vpop.permute.xlu0 %300 }
 0x120   :  { %v303_v42 = vmul.f32 %v301_v41, %v2175_v40 }
 0x122   :  { %305 = vrot.lane.b32.xlu0 %v303_v42, %s1997_s3  ;;  %v164_v42 = vpop.f32.mrf.mxu1 }
 0x194   :  { %v306_v23 = vpop.permute.xlu0 %305 }
 0x195   :  { %v2306_v24 = vadd.f32 %v306_v23, %v298_v19  ;;  %v165_v23 = vadd.f32 %v164_v42, %v2160_v21 }
 0x197   :  { %1800 = vtanh.f32 %v2306_v24 }
 0x19d   :  { %v1801_v34 = vpop.eup %1800 }
 0x19e   :  { %311 = vrot.lane.b32.xlu1 %v1801_v34, %s1997_s3 }
 0x210   :  { %v312_v36 = vpop.permute.xlu1 %311 }
 0x211   :  { %v314_v37 = vmul.f32 %v312_v36, %v2168_v32  ;;  %v352_v32 = vpop.f32.mrf.mxu3 }
 0x213   :  { %1744 = vmatmul.msk.f32.vlgmr.msra.gmra.mxu2 %vm244_vm2, %v314_v37  ;;  %1745 = vmatmul.msk.f32.vlgmr.msra.gmra.mxu3 %vm244_vm2, %v314_v37 }
 0x214   :  { %546 = vmatpush.msra.mxu2 %v2240_v59  ;;  %566 = vmatpush.msra.mxu3 %v2245_v60 }
 0x216   :  { %547 = vmatpush.msra.mxu2 %v2254_v61  ;;  %567 = vmatpush.msra.mxu3 %v2259_v62 }
 0x218   :  { %548 = vmatpush.msra.mxu2 %v2266_v63  ;;  %568 = vmatpush.msra.mxu3 %v2271_v3 }
 0x21a   :  { %549 = vmatpush.msra.mxu2 %v2280_v4  ;;  %569 = vmatpush.msra.mxu3 %v2285_v10 }
 0x21b   :  { %1746 = vmatmul.msk.f32.vlgmr.msrb.gmra.mxu2 %vm244_vm2, %v314_v37  ;;  %1747 = vmatmul.msk.f32.vlgmr.msrb.gmra.mxu3 %vm244_vm2, %v314_v37 }
 0x21c   :  { %550 = vmatpush.msra.mxu2 %v2295_v20  ;;  %570 = vmatpush.msra.mxu3 %v2300_v22 }
 0x21e   :  { %551 = vmatpush.msra.mxu2 %v2311_v25  ;;  %571 = vmatpush.msra.mxu3 %v2316_v26 }
 0x220   :  { %552 = vmatpush.msra.mxu2 %v2326_v27  ;;  %572 = vmatpush.msra.mxu3 %v2331_v29 }
 0x222   :  { %553 = vmatpush.msra.mxu2 %v2340_v30  ;;  %573 = vmatpush.msra.mxu3 %v2345_v31 }
 0x224   :  { %683 = vmatpush.msrb.mxu2 %v2179_v43  ;;  %703 = vmatpush.msrb.mxu3 %v2181_v44 }
 0x226   :  { %684 = vmatpush.msrb.mxu2 %v2183_v45  ;;  %704 = vmatpush.msrb.mxu3 %v2187_v46 }
 0x228   :  { %685 = vmatpush.msrb.mxu2 %v2189_v47  ;;  %705 = vmatpush.msrb.mxu3 %v2191_v48 }
 0x22a   :  { %686 = vmatpush.msrb.mxu2 %v2197_v49  ;;  %706 = vmatpush.msrb.mxu3 %v2199_v50 }
 0x22c   :  { %687 = vmatpush.msrb.mxu2 %v2205_v51  ;;  %707 = vmatpush.msrb.mxu3 %v2207_v52 }
 0x22e   :  { %688 = vmatpush.msrb.mxu2 %v2213_v53  ;;  %708 = vmatpush.msrb.mxu3 %v2215_v54 }
 0x230   :  { %689 = vmatpush.msrb.mxu2 %v2221_v55  ;;  %709 = vmatpush.msrb.mxu3 %v2223_v56 }
 0x232   :  { %690 = vmatpush.msrb.mxu2 %v2229_v57  ;;  %710 = vmatpush.msrb.mxu3 %v2231_v58 }
 0x296   :  { %v395_v40 = vpop.f32.mrf.mxu3 }
 0x297   :  { %v396_v41 = vadd.f32 %v395_v40, %v352_v32 }
 0x299   :  { %v399_v19 = vadd.f32 %v396_v41, %v2423_v39  ;;  %v332_v41 = vpop.f32.mrf.mxu2 }
 0x29b   :  { %1802 = vtanh.f32 %v399_v19  ;;  %v2436_v19 = vperm.slane %v233_v38, 0 }
 0x29e   :  { %v462_v34 = vpop.f32.mrf.mxu3 }
 0x29f   :  { %v466_v35 = vadd.f32 %v462_v34, %v165_v23 }
 0x2a1   :  { %v1803_v36 = vpop.eup %1802  ;;  %1804 = vtanh.f32 %v466_v35  ;;  %v375_v42 = vpop.f32.mrf.mxu2 }
 0x2a2   :  { %v403_v37 = vmul.f32 0.5, %v1803_v36  ;;  %v376_v23 = vadd.f32 %v375_v42, %v332_v41 }
 0x2a4   :  { %v405_v58 = vadd.f32 0.5, %v403_v37  ;;  %v398_v34 = vadd.f32 %v376_v23, %v2436_v19  ;;  %v64_v23 = vld [vmem:[%s3164_s0 + $0x10] sm:$0xff] }
 0x2a5   :  { %1730 = vmatmul.msk.f32.gmra.mxu0 %vm78_vm0, %v64_v23  ;;  %1738 = vmatmul.msk.f32.gmra.mxu1 %vm78_vm0, %v64_v23  ;;  %v3221_v23 = vld [vmem:[#allocation9_spill] sm:$0xff] }
 0x2a6   :  { %v407_v57 = vsel %vm243_vm1, %v405_v58, %v1803_v36  ;;  %1806 = vtanh.f32 %v398_v34 }
 0x2a7   :  { %v1805_v16 = vpop.eup %1804  ;;  %410 = vrot.lane.b32.xlu2 %v407_v57, %s1997_s3 }
 0x2a8   :  { %v470_v18 = vmul.f32 0.5, %v1805_v16 }
 0x2a9   :  { %v442_v28 = vpop.f32.mrf.mxu2 }
 0x2aa   :  { %v472_v32 = vadd.f32 0.5, %v470_v18 }
 0x2ac   :  { %v2432_v40 = vsel %vm243_vm1, %v472_v32, %v1805_v16  ;;  %v1807_v58 = vpop.eup %1806  ;;  %v123_v16 = vpop.f32.mrf.mxu0 }
 0x2ad   :  { %477 = vrot.lane.b32.xlu1 %v2432_v40, %s1997_s3  ;;  %v402_v35 = vmul.f32 0.5, %v1807_v58  ;;  %v124_v32 = vadd.f32 %v123_v16, %v2172_v33 }
 0x2af   :  { %v404_v36 = vadd.f32 0.5, %v402_v35  ;;  %v465_v39 = vadd.f32 %v442_v28, %v124_v32  ;;  %v65_v28 = vld [vmem:[%s3164_s0 + $0x18] sm:$0xff] }
 0x2b0   :  { %1731 = vmatmul.msk.f32.gmra.mxu0 %vm78_vm0, %v65_v28  ;;  %1739 = vmatmul.msk.f32.gmra.mxu1 %vm78_vm0, %v65_v28  ;;  %v3222_v28 = vld [vmem:[#allocation8_spill] sm:$0xff] }
 0x2b1   :  { %1808 = vtanh.f32 %v465_v39  ;;  %v408_v39 = vmul.f32 0.0, %v404_v36 }
 0x2b7   :  { %v1809_v21 = vpop.eup %1808 }
 0x2b8   :  { %v469_v38 = vmul.f32 0.5, %v1809_v21  ;;  %v66_v21 = vld [vmem:[%s3164_s0 + $0x20] sm:$0xff] }
 0x2b9   :  { %1732 = vmatmul.msk.f32.gmra.mxu0 %vm78_vm0, %v66_v21  ;;  %1740 = vmatmul.msk.f32.gmra.mxu1 %vm78_vm0, %v66_v21  ;;  %v3223_v21 = vld [vmem:[#allocation17_spill] sm:$0xff] }
 0x2ba   :  { %v471_v56 = vadd.f32 0.5, %v469_v38 }
 0x2bc   :  { %v475_v35 = vmul.f32 %v471_v56, %v2306_v24 }
 0x301   :  { %v411_v37 = vpop.permute.xlu2 %410 }
 0x302   :  { %v413_v18 = vmul.f32 %v411_v37, %v404_v36  ;;  %v69_v36 = vld [vmem:[%s3164_s0 + $0x38] sm:$0xff] }
 0x304   :  { %415 = vrot.lane.b32.xlu0 %v413_v18, %s1997_s3  ;;  %v67_v18 = vld [vmem:[%s3164_s0 + $0x28] sm:$0xff] }
 0x305   :  { %1733 = vmatmul.msk.f32.gmra.mxu0 %vm78_vm0, %v67_v18  ;;  %1741 = vmatmul.msk.f32.gmra.mxu1 %vm78_vm0, %v67_v18 }
 0x31f   :  { %v478_v41 = vpop.permute.xlu1 %477 }
 0x320   :  { %v480_v42 = vmul.f32 %v478_v41, %v471_v56  ;;  %v68_v56 = vld [vmem:[%s3164_s0 + $0x30] sm:$0xff] }
 0x321   :  { %1734 = vmatmul.msk.f32.gmra.mxu0 %vm78_vm0, %v68_v56  ;;  %1742 = vmatmul.msk.f32.gmra.mxu1 %vm78_vm0, %v68_v56 }
 0x322   :  { %482 = vrot.lane.b32.xlu2 %v480_v42, %s1997_s3 }
 0x329   :  { %1735 = vmatmul.msk.f32.gmra.mxu0 %vm78_vm0, %v69_v36  ;;  %1743 = vmatmul.msk.f32.gmra.mxu1 %vm78_vm0, %v69_v36  ;;  %v3230_v36 = vld [vmem:[#allocation10_spill] sm:$0xff] }
 0x376   :  { %v416_v34 = vpop.permute.xlu0 %415 }
 0x377   :  { %v2455_v58 = vadd.f32 %v416_v34, %v408_v39  ;;  %v3224_v39 = vld [vmem:[#allocation18_spill] sm:$0xff]  ;;  %v167_v34 = vpop.f32.mrf.mxu1 }
 0x379   :  { %1810 = vtanh.f32 %v2455_v58 }
 0x37c   :  { %v483_v37 = vpop.permute.xlu2 %482 }
 0x37d   :  { %v2464_v16 = vadd.f32 %v483_v37, %v475_v35 }
 0x37f   :  { %v1811_v32 = vpop.eup %1810  ;;  %1812 = vtanh.f32 %v2464_v16  ;;  %v2536_v35 = vpop.f32.mrf.mxu1 }
 0x380   :  { %421 = vrot.lane.b32.xlu2 %v1811_v32, %s1997_s3  ;;  %3225 = vst [vmem:[#allocation9_spill] sm:$0xff] %v2536_v35 }
 0x385   :  { %v1813_v24 = vpop.eup %1812 }
 0x386   :  { %488 = vrot.lane.b32.xlu1 %v1813_v24, %s1997_s3 }
 0x387   :  { %v2538_v37 = vpop.f32.mrf.mxu1 }
 0x388   :  { %3226 = vst [vmem:[#allocation8_spill] sm:$0xff] %v2538_v37 }
 0x38f   :  { %v2540_v18 = vpop.f32.mrf.mxu1 }
 0x390   :  { %3227 = vst [vmem:[#allocation20_spill] sm:$0xff] %v2540_v18 }
 0x39e   :  { %v2542_v32 = vpop.f32.mrf.mxu1 }
 0x39f   :  { %3228 = vst [vmem:[#allocation21_spill] sm:$0xff] %v2542_v32 }
 0x3a6   :  { %v2544_v56 = vpop.f32.mrf.mxu1 }
 0x3a7   :  { %3229 = vst [vmem:[#allocation22_spill] sm:$0xff] %v2544_v56 }
 0x3da   :  { %v422_v38 = vpop.permute.xlu2 %421 }
 0x3db   :  { %v424_v41 = vmul.f32 %v422_v38, %v407_v57  ;;  %v168_v38 = vadd.f32 %v167_v34, %v3230_v36 }
 0x3dd   :  { %1748 = vmatmul.msk.f32.vlgmr.msrb.gmra.mxu0 %vm244_vm2, %v424_v41  ;;  %1749 = vmatmul.msk.f32.vlgmr.msrb.gmra.mxu1 %vm244_vm2, %v424_v41 }
 0x3de   :  { %726 = vmatpush.msrb.mxu0 %v2240_v59  ;;  %746 = vmatpush.msrb.mxu1 %v2245_v60 }
 0x3e0   :  { %727 = vmatpush.msrb.mxu0 %v2254_v61  ;;  %747 = vmatpush.msrb.mxu1 %v2259_v62 }
 0x3e2   :  { %728 = vmatpush.msrb.mxu0 %v2266_v63  ;;  %748 = vmatpush.msrb.mxu1 %v2271_v3 }
 0x3e4   :  { %729 = vmatpush.msrb.mxu0 %v2280_v4  ;;  %749 = vmatpush.msrb.mxu1 %v2285_v10 }
 0x3e6   :  { %730 = vmatpush.msrb.mxu0 %v2295_v20  ;;  %750 = vmatpush.msrb.mxu1 %v2300_v22 }
 0x3e8   :  { %731 = vmatpush.msrb.mxu0 %v2311_v25  ;;  %751 = vmatpush.msrb.mxu1 %v2316_v26 }
 0x3ea   :  { %732 = vmatpush.msrb.mxu0 %v2326_v27  ;;  %752 = vmatpush.msrb.mxu1 %v2331_v29 }
 0x3ec   :  { %733 = vmatpush.msrb.mxu0 %v2340_v30  ;;  %753 = vmatpush.msrb.mxu1 %v2345_v31 }
 0x3f8   :  { %v489_v57 = vpop.permute.xlu1 %488 }
 0x3f9   :  { %v491_v42 = vmul.f32 %v489_v57, %v2432_v40  ;;  %v3220_v40 = vld [vmem:[#allocation16_spill] sm:$0xff] }
 0x3fb   :  { %1750 = vmatmul.msk.f32.vlgmr.msra.gmra.mxu2 %vm244_vm2, %v491_v42  ;;  %1751 = vmatmul.msk.f32.vlgmr.msra.gmra.mxu3 %vm244_vm2, %v491_v42 }
 0x3fc   :  { %1752 = vmatmul.msk.f32.vlgmr.msra.gmra.mxu0 %vm244_vm2, %v491_v42  ;;  %1753 = vmatmul.msk.f32.vlgmr.msra.gmra.mxu1 %vm244_vm2, %v491_v42 }
 0x3fd   :  { %793 = vmatpush.msra.mxu2 %v2077_v5  ;;  %813 = vmatpush.msra.mxu3 %v2057_v0 }
 0x3fe   :  { %863 = vmatpush.msra.mxu0 %v2179_v43  ;;  %883 = vmatpush.msra.mxu1 %v2181_v44 }
 0x3ff   :  { %794 = vmatpush.msra.mxu2 %v2082_v6  ;;  %814 = vmatpush.msra.mxu3 %v2062_v1 }
 0x400   :  { %864 = vmatpush.msra.mxu0 %v2183_v45  ;;  %884 = vmatpush.msra.mxu1 %v2187_v46 }
 0x401   :  { %795 = vmatpush.msra.mxu2 %v2095_v8  ;;  %815 = vmatpush.msra.mxu3 %v2068_v2 }
 0x402   :  { %865 = vmatpush.msra.mxu0 %v2189_v47  ;;  %885 = vmatpush.msra.mxu1 %v2191_v48 }
 0x403   :  { %796 = vmatpush.msra.mxu2 %v2107_v11  ;;  %816 = vmatpush.msra.mxu3 %v2087_v7 }
 0x404   :  { %866 = vmatpush.msra.mxu0 %v2197_v49  ;;  %886 = vmatpush.msra.mxu1 %v2199_v50 }
 0x405   :  { %797 = vmatpush.msra.mxu2 %v2120_v13  ;;  %817 = vmatpush.msra.mxu3 %v2100_v9 }
 0x406   :  { %867 = vmatpush.msra.mxu0 %v2205_v51  ;;  %887 = vmatpush.msra.mxu1 %v2207_v52 }
 0x407   :  { %798 = vmatpush.msra.mxu2 %v2132_v15  ;;  %818 = vmatpush.msra.mxu3 %v2112_v12 }
 0x408   :  { %868 = vmatpush.msra.mxu0 %v2213_v53  ;;  %888 = vmatpush.msra.mxu1 %v2215_v54 }
 0x409   :  { %799 = vmatpush.msra.mxu2 %v2144_v17  ;;  %819 = vmatpush.msra.mxu3 %v2125_v14 }
 0x40a   :  { %869 = vmatpush.msra.mxu0 %v2221_v55  ;;  %889 = vmatpush.msra.mxu1 %v3220_v40 }
 0x40b   :  { %800 = vmatpush.msra.mxu2 %v3221_v23  ;;  %820 = vmatpush.msra.mxu3 %v3222_v28 }
 0x40c   :  { %870 = vmatpush.msra.mxu0 %v3223_v21  ;;  %890 = vmatpush.msra.mxu1 %v3224_v39  ;;  %v3231_v39 = vld [vmem:[#allocation19_spill] sm:$0xff] }
 0x45a   :  { %v532_v24 = vpop.f32.mrf.mxu1 }
 0x479   :  { %v642_v41 = vpop.f32.mrf.mxu1 }
 0x47a   :  { %v646_v57 = vadd.f32 %v642_v41, %v168_v38 }
 0x47c   :  { %1814 = vtanh.f32 %v646_v57 }
 0x47e   :  { %v575_v42 = vpop.f32.mrf.mxu3 }
 0x47f   :  { %v576_v21 = vadd.f32 %v575_v42, %v532_v24  ;;  %v126_v24 = vpop.f32.mrf.mxu0  ;;  %v555_v42 = vpop.f32.mrf.mxu2 }
 0x480   :  { %v127_v41 = vadd.f32 %v126_v24, %v2172_v33 }
 0x481   :  { %v579_v40 = vadd.f32 %v576_v21, %v3231_v39 }
 0x482   :  { %v1815_v55 = vpop.eup %1814 }
 0x483   :  { %1816 = vtanh.f32 %v579_v40  ;;  %v650_v35 = vmul.f32 0.5, %v1815_v55 }
 0x485   :  { %v652_v37 = vadd.f32 0.5, %v650_v35 }
 0x487   :  { %v654_v18 = vsel %vm243_vm1, %v652_v37, %v1815_v55  ;;  %v2554_v38 = vpop.f32.mrf.mxu0 }
 0x488   :  { %657 = vrot.lane.b32.xlu1 %v654_v18, %s1997_s3  ;;  %3233 = vst [vmem:[#allocation23_spill] sm:$0xff] %v2554_v38 }
 0x489   :  { %v1817_v56 = vpop.eup %1816 }
 0x48a   :  { %v583_v32 = vmul.f32 0.5, %v1817_v56 }
 0x48c   :  { %v585_v53 = vadd.f32 0.5, %v583_v32 }
 0x48e   :  { %v587_v34 = vsel %vm243_vm1, %v585_v53, %v1817_v56 }
 0x48f   :  { %590 = vrot.lane.b32.xlu0 %v587_v34, %s1997_s3  ;;  %v2556_v21 = vpop.f32.mrf.mxu0 }
 0x490   :  { %3234 = vst [vmem:[#allocation24_spill] sm:$0xff] %v2556_v21 }
 0x497   :  { %v2558_v40 = vpop.f32.mrf.mxu0 }
 0x498   :  { %3235 = vst [vmem:[#allocation25_spill] sm:$0xff] %v2558_v40 }
 0x49f   :  { %v2560_v35 = vpop.f32.mrf.mxu0 }
 0x4a0   :  { %3236 = vst [vmem:[#allocation26_spill] sm:$0xff] %v2560_v35 }
 0x4a7   :  { %v2562_v55 = vpop.f32.mrf.mxu0 }
 0x4a8   :  { %3237 = vst [vmem:[#allocation27_spill] sm:$0xff] %v2562_v55 }
 0x4af   :  { %v512_v37 = vpop.f32.mrf.mxu0 }
 0x4b0   :  { %v556_v53 = vadd.f32 %v555_v42, %v512_v37 }
 0x4b2   :  { %v578_v56 = vadd.f32 %v556_v53, %v2436_v19 }
 0x4b7   :  { %v622_v32 = vpop.f32.mrf.mxu0 }
 0x4b8   :  { %v645_v57 = vadd.f32 %v622_v32, %v127_v41 }
 0x4ba   :  { %1818 = vtanh.f32 %v645_v57 }
 0x4bb   :  { %1820 = vtanh.f32 %v578_v56 }
 0x4c0   :  { %v1819_v54 = vpop.eup %1818 }
 0x4c1   :  { %v649_v38 = vmul.f32 0.5, %v1819_v54  ;;  %v1821_v21 = vpop.eup %1820 }
 0x4c2   :  { %v582_v35 = vmul.f32 0.5, %v1821_v21 }
 0x4c3   :  { %v651_v36 = vadd.f32 0.5, %v649_v38 }
 0x4c4   :  { %v584_v55 = vadd.f32 0.5, %v582_v35 }
 0x4c5   :  { %v655_v38 = vmul.f32 %v651_v36, %v2464_v16 }
 0x4c6   :  { %v588_v37 = vmul.f32 %v584_v55, %v2455_v58 }
 0x4fa   :  { %v658_v40 = vpop.permute.xlu1 %657 }
 0x4fb   :  { %v660_v39 = vmul.f32 %v658_v40, %v651_v36 }
 0x4fd   :  { %662 = vrot.lane.b32.xlu0 %v660_v39, %s1997_s3 }
 0x501   :  { %v591_v52 = vpop.permute.xlu0 %590 }
 0x502   :  { %v593_v24 = vmul.f32 %v591_v52, %v584_v55 }
 0x504   :  { %595 = vrot.lane.b32.xlu2 %v593_v24, %s1997_s3 }
 0x55e   :  { %v596_v41 = vpop.permute.xlu2 %595 }
 0x55f   :  { %v2569_v32 = vadd.f32 %v596_v41, %v588_v37 }
 0x561   :  { %1822 = vtanh.f32 %v2569_v32 }
 0x567   :  { %v1823_v54 = vpop.eup %1822 }
 0x568   :  { %601 = vrot.lane.b32.xlu1 %v1823_v54, %s1997_s3 }
 0x56f   :  { %v663_v21 = vpop.permute.xlu0 %662 }
 0x570   :  { %v2574_v40 = vadd.f32 %v663_v21, %v655_v38 }
 0x572   :  { %1824 = vtanh.f32 %v2574_v40 }
 0x578   :  { %v1825_v52 = vpop.eup %1824 }
 0x579   :  { %668 = vrot.lane.b32.xlu2 %v1825_v52, %s1997_s3 }
 0x5d3   :  { %v669_v39 = vpop.permute.xlu2 %668 }
 0x5d4   :  { %v671_v58 = vmul.f32 %v669_v39, %v654_v18  ;;  %v3249_v39 = vld [vmem:[#allocation23_spill] sm:$0xff] }
 0x5d6   :  { %1756 = vmatmul.msk.f32.vlgmr.msrb.gmra.mxu0 %vm244_vm2, %v671_v58  ;;  %1757 = vmatmul.msk.f32.vlgmr.msrb.gmra.mxu1 %vm244_vm2, %v671_v58 }
 0x5d7   :  { %973 = vmatpush.msrb.mxu0 %v2077_v5  ;;  %993 = vmatpush.msrb.mxu1 %v2057_v0  ;;  %v3238_v0 = vld [vmem:[#allocation12_spill] sm:$0xff]  ;;  %v3241_v5 = vld [vmem:[#allocation15_spill] sm:$0xff] }
 0x5d9   :  { %974 = vmatpush.msrb.mxu0 %v2082_v6  ;;  %994 = vmatpush.msrb.mxu1 %v2062_v1  ;;  %v3239_v1 = vld [vmem:[#allocation13_spill] sm:$0xff]  ;;  %v3242_v6 = vld [vmem:[#allocation16_spill] sm:$0xff] }
 0x5da   :  { %v602_v16 = vpop.permute.xlu1 %601 }
 0x5db   :  { %v604_v36 = vmul.f32 %v602_v16, %v587_v34  ;;  %975 = vmatpush.msrb.mxu0 %v2095_v8  ;;  %995 = vmatpush.msrb.mxu1 %v2068_v2  ;;  %v3240_v2 = vld [vmem:[#allocation14_spill] sm:$0xff] }
 0x5dc   :  { %v3244_v8 = vld [vmem:[#allocation18_spill] sm:$0xff] }
 0x5dd   :  { %1754 = vmatmul.msk.f32.vlgmr.msrb.gmra.mxu2 %vm244_vm2, %v604_v36  ;;  %1755 = vmatmul.msk.f32.vlgmr.msrb.gmra.mxu3 %vm244_vm2, %v604_v36 }
 0x5de   :  { %906 = vmatpush.msrb.mxu2 %v2240_v59  ;;  %926 = vmatpush.msrb.mxu3 %v2245_v60 }
 0x5df   :  { %976 = vmatpush.msrb.mxu0 %v2107_v11  ;;  %996 = vmatpush.msrb.mxu1 %v2087_v7  ;;  %v3243_v7 = vld [vmem:[#allocation17_spill] sm:$0xff] }
 0x5e0   :  { %907 = vmatpush.msrb.mxu2 %v2254_v61  ;;  %927 = vmatpush.msrb.mxu3 %v2259_v62 }
 0x5e1   :  { %977 = vmatpush.msrb.mxu0 %v2120_v13  ;;  %997 = vmatpush.msrb.mxu1 %v2100_v9  ;;  %v3245_v13 = vld [vmem:[#allocation19_spill] sm:$0xff] }
 0x5e2   :  { %908 = vmatpush.msrb.mxu2 %v2266_v63  ;;  %928 = vmatpush.msrb.mxu3 %v2271_v3 }
 0x5e3   :  { %978 = vmatpush.msrb.mxu0 %v2132_v15  ;;  %998 = vmatpush.msrb.mxu1 %v2112_v12  ;;  %v3246_v15 = vld [vmem:[#allocation10_spill] sm:$0xff] }
 0x5e4   :  { %909 = vmatpush.msrb.mxu2 %v2280_v4  ;;  %929 = vmatpush.msrb.mxu3 %v2285_v10 }
 0x5e5   :  { %1758 = vmatmul.msk.f32.vlgmr.msra.gmra.mxu2 %vm244_vm2, %v671_v58  ;;  %1759 = vmatmul.msk.f32.vlgmr.msra.gmra.mxu3 %vm244_vm2, %v671_v58  ;;  %v130_v58 = vadd.f32 %v3249_v39, %v2172_v33  ;;  %v3251_v39 = vld [vmem:[#allocation24_spill] sm:$0xff] }
 0x5e6   :  { %910 = vmatpush.msrb.mxu2 %v2295_v20  ;;  %930 = vmatpush.msrb.mxu3 %v2300_v22 }
 0x5e7   :  { %979 = vmatpush.msrb.mxu0 %v2144_v17  ;;  %999 = vmatpush.msrb.mxu1 %v2125_v14  ;;  %v3247_v17 = vld [vmem:[#allocation9_spill] sm:$0xff] }
 0x5e8   :  { %911 = vmatpush.msrb.mxu2 %v2311_v25  ;;  %931 = vmatpush.msrb.mxu3 %v2316_v26 }
 0x5e9   :  { %980 = vmatpush.msrb.mxu0 %v3221_v23  ;;  %1000 = vmatpush.msrb.mxu1 %v3222_v28  ;;  %v171_v23 = vadd.f32 %v3247_v17, %v3246_v15 }
 0x5ea   :  { %912 = vmatpush.msrb.mxu2 %v2326_v27  ;;  %932 = vmatpush.msrb.mxu3 %v2331_v29 }
 0x5ec   :  { %913 = vmatpush.msrb.mxu2 %v2340_v30  ;;  %933 = vmatpush.msrb.mxu3 %v2345_v31 }
 0x5ee   :  { %1043 = vmatpush.msra.mxu2 %v2179_v43  ;;  %1063 = vmatpush.msra.mxu3 %v2181_v44 }
 0x5f0   :  { %1044 = vmatpush.msra.mxu2 %v2183_v45  ;;  %1064 = vmatpush.msra.mxu3 %v2187_v46 }
 0x5f2   :  { %1045 = vmatpush.msra.mxu2 %v2189_v47  ;;  %1065 = vmatpush.msra.mxu3 %v2191_v48 }
 0x5f4   :  { %1046 = vmatpush.msra.mxu2 %v2197_v49  ;;  %1066 = vmatpush.msra.mxu3 %v2199_v50 }
 0x5f6   :  { %1047 = vmatpush.msra.mxu2 %v2205_v51  ;;  %1067 = vmatpush.msra.mxu3 %v3238_v0 }
 0x5f8   :  { %1048 = vmatpush.msra.mxu2 %v3239_v1  ;;  %1068 = vmatpush.msra.mxu3 %v3240_v2 }
 0x5fa   :  { %1049 = vmatpush.msra.mxu2 %v3241_v5  ;;  %1069 = vmatpush.msra.mxu3 %v3242_v6 }
 0x5fc   :  { %1050 = vmatpush.msra.mxu2 %v3243_v7  ;;  %1070 = vmatpush.msra.mxu3 %v3244_v8 }
 0x653   :  { %v755_v9 = vpop.f32.mrf.mxu1  ;;  %v735_v54 = vpop.f32.mrf.mxu0 }
 0x660   :  { %v712_v11 = vpop.f32.mrf.mxu3  ;;  %v692_v41 = vpop.f32.mrf.mxu2 }
 0x661   :  { %v756_v12 = vadd.f32 %v755_v9, %v712_v11  ;;  %v736_v38 = vadd.f32 %v735_v54, %v692_v41 }
 0x663   :  { %v759_v14 = vadd.f32 %v756_v12, %v3245_v13  ;;  %v758_v21 = vadd.f32 %v736_v38, %v2436_v19 }
 0x665   :  { %1826 = vtanh.f32 %v759_v14 }
 0x668   :  { %v822_v28 = vpop.f32.mrf.mxu3  ;;  %v802_v52 = vpop.f32.mrf.mxu2 }
 0x669   :  { %v826_v18 = vadd.f32 %v822_v28, %v171_v23  ;;  %v825_v16 = vadd.f32 %v802_v52, %v130_v58  ;;  %v133_v58 = vadd.f32 %v3251_v39, %v2172_v33  ;;  %v2929_v39 = vld [vmem:[%s3168_s4 + $0x8] sm:$0xff] }
 0x66b   :  { %v1827_v34 = vpop.eup %1826  ;;  %1828 = vtanh.f32 %v826_v18 }
 0x66c   :  { %v763_v35 = vmul.f32 0.5, %v1827_v34  ;;  %1830 = vtanh.f32 %v758_v21 }
 0x66d   :  { %1832 = vtanh.f32 %v825_v16 }
 0x66e   :  { %v765_v55 = vadd.f32 0.5, %v763_v35 }
 0x670   :  { %v767_v42 = vsel %vm243_vm1, %v765_v55, %v1827_v34 }
 0x671   :  { %v1829_v53 = vpop.eup %1828  ;;  %770 = vrot.lane.b32.xlu1 %v767_v42, %s1997_s3 }
 0x672   :  { %v830_v56 = vmul.f32 0.5, %v1829_v53  ;;  %v1831_v36 = vpop.eup %1830 }
 0x673   :  { %v762_v9 = vmul.f32 0.5, %v1831_v36  ;;  %v1833_v11 = vpop.eup %1832 }
 0x674   :  { %v832_v24 = vadd.f32 0.5, %v830_v56  ;;  %v829_v17 = vmul.f32 0.5, %v1833_v11 }
 0x675   :  { %v764_v12 = vadd.f32 0.5, %v762_v9 }
 0x676   :  { %v834_v37 = vsel %vm243_vm1, %v832_v24, %v1829_v53  ;;  %v831_v28 = vadd.f32 0.5, %v829_v17 }
 0x677   :  { %837 = vrot.lane.b32.xlu0 %v834_v37, %s1997_s3  ;;  %v768_v24 = vmul.f32 %v764_v12, %v2569_v32 }
 0x678   :  { %v835_v35 = vmul.f32 %v831_v28, %v2574_v40 }
 0x6e3   :  { %v771_v14 = vpop.permute.xlu1 %770 }
 0x6e4   :  { %v773_v23 = vmul.f32 %v771_v14, %v764_v12 }
 0x6e6   :  { %775 = vrot.lane.b32.xlu0 %v773_v23, %s1997_s3 }
 0x6e9   :  { %v838_v18 = vpop.permute.xlu0 %837 }
 0x6ea   :  { %v840_v34 = vmul.f32 %v838_v18, %v831_v28 }
 0x6ec   :  { %842 = vrot.lane.b32.xlu2 %v840_v34, %s1997_s3 }
 0x746   :  { %v843_v55 = vpop.permute.xlu2 %842 }
 0x747   :  { %v2647_v53 = vadd.f32 %v843_v55, %v835_v35 }
 0x749   :  { %1834 = vtanh.f32 %v2647_v53 }
 0x74f   :  { %v1835_v56 = vpop.eup %1834 }
 0x750   :  { %848 = vrot.lane.b32.xlu1 %v1835_v56, %s1997_s3 }
 0x758   :  { %v776_v41 = vpop.permute.xlu0 %775 }
 0x759   :  { %v2652_v54 = vadd.f32 %v776_v41, %v768_v24 }
 0x75b   :  { %1836 = vtanh.f32 %v2652_v54 }
 0x761   :  { %v1837_v38 = vpop.eup %1836 }
 0x762   :  { %781 = vrot.lane.b32.xlu2 %v1837_v38, %s1997_s3 }
 0x7bc   :  { %v782_v21 = vpop.permute.xlu2 %781 }
 0x7bd   :  { %v784_v40 = vmul.f32 %v782_v21, %v767_v42 }
 0x7bf   :  { %1760 = vmatmul.msk.f32.vlgmr.msra.gmra.mxu0 %vm244_vm2, %v784_v40  ;;  %1761 = vmatmul.msk.f32.vlgmr.msra.gmra.mxu1 %vm244_vm2, %v784_v40 }
 0x7c0   :  { %1086 = vmatpush.msra.mxu0 %v2240_v59  ;;  %1106 = vmatpush.msra.mxu1 %v2245_v60  ;;  %v2675_v59 = vld [vmem:[%s3166_s2 + $0x70] sm:$0xff]  ;;  %v2681_v60 = vld [vmem:[%s3166_s2 + $0x78] sm:$0xff] }
 0x7c2   :  { %v849_v52 = vpop.permute.xlu1 %848  ;;  %1087 = vmatpush.msra.mxu0 %v2254_v61  ;;  %1107 = vmatpush.msra.mxu1 %v2259_v62  ;;  %v2689_v61 = vld [vmem:[%s3166_s2 + $0x60] sm:$0xff]  ;;  %v2695_v62 = vld [vmem:[%s3166_s2 + $0x68] sm:$0xff] }
 0x7c3   :  { %v851_v32 = vmul.f32 %v849_v52, %v834_v37 }
 0x7c4   :  { %1088 = vmatpush.msra.mxu0 %v2266_v63  ;;  %1108 = vmatpush.msra.mxu1 %v2271_v3  ;;  %v2703_v63 = vld [vmem:[%s3166_s2 + $0x50] sm:$0xff]  ;;  %v2709_v3 = vld [vmem:[%s3166_s2 + $0x58] sm:$0xff] }
 0x7c5   :  { %1762 = vmatmul.msk.f32.vlgmr.msrb.gmra.mxu2 %vm244_vm2, %v851_v32  ;;  %1763 = vmatmul.msk.f32.vlgmr.msrb.gmra.mxu3 %vm244_vm2, %v851_v32 }
 0x7c6   :  { %1089 = vmatpush.msra.mxu0 %v2280_v4  ;;  %1109 = vmatpush.msra.mxu1 %v2285_v10  ;;  %v2717_v4 = vld [vmem:[%s3166_s2 + $0x40] sm:$0xff]  ;;  %v2723_v10 = vld [vmem:[%s3166_s2 + $0x48] sm:$0xff] }
 0x7c7   :  { %1764 = vmatmul.msk.f32.vlgmr.msrb.gmra.mxu0 %vm244_vm2, %v851_v32  ;;  %1765 = vmatmul.msk.f32.vlgmr.msrb.gmra.mxu1 %vm244_vm2, %v851_v32 }
 0x7c8   :  { %1090 = vmatpush.msra.mxu0 %v2295_v20  ;;  %1110 = vmatpush.msra.mxu1 %v2300_v22  ;;  %v2731_v20 = vld [vmem:[%s3166_s2 + $0x30] sm:$0xff]  ;;  %v2737_v22 = vld [vmem:[%s3166_s2 + $0x38] sm:$0xff] }
 0x7c9   :  { %1153 = vmatpush.msrb.mxu2 %v2675_v59  ;;  %1173 = vmatpush.msrb.mxu3 %v2681_v60 }
 0x7ca   :  { %1091 = vmatpush.msra.mxu0 %v2311_v25  ;;  %1111 = vmatpush.msra.mxu1 %v2316_v26 }
 0x7cb   :  { %1154 = vmatpush.msrb.mxu2 %v2689_v61  ;;  %1174 = vmatpush.msrb.mxu3 %v2695_v62 }
 0x7cc   :  { %1092 = vmatpush.msra.mxu0 %v2326_v27  ;;  %1112 = vmatpush.msra.mxu1 %v2331_v29 }
 0x7cd   :  { %1155 = vmatpush.msrb.mxu2 %v2703_v63  ;;  %1175 = vmatpush.msrb.mxu3 %v2709_v3 }
 0x7ce   :  { %1093 = vmatpush.msra.mxu0 %v2340_v30  ;;  %1113 = vmatpush.msra.mxu1 %v2345_v31 }
 0x7cf   :  { %1156 = vmatpush.msrb.mxu2 %v2717_v4  ;;  %1176 = vmatpush.msrb.mxu3 %v2723_v10 }
 0x7d0   :  { %1223 = vmatpush.msrb.mxu0 %v2179_v43  ;;  %1243 = vmatpush.msrb.mxu1 %v2181_v44  ;;  %v2745_v43 = vld [vmem:[%s3166_s2 + $0x20] sm:$0xff]  ;;  %v2751_v44 = vld [vmem:[%s3166_s2 + $0x28] sm:$0xff] }
 0x7d1   :  { %1157 = vmatpush.msrb.mxu2 %v2731_v20  ;;  %1177 = vmatpush.msrb.mxu3 %v2737_v22 }
 0x7d2   :  { %1224 = vmatpush.msrb.mxu0 %v2183_v45  ;;  %1244 = vmatpush.msrb.mxu1 %v2187_v46  ;;  %v2759_v45 = vld [vmem:[%s3166_s2 + $0x10] sm:$0xff]  ;;  %v2765_v46 = vld [vmem:[%s3166_s2 + $0x18] sm:$0xff] }
 0x7d3   :  { %1158 = vmatpush.msrb.mxu2 %v2745_v43  ;;  %1178 = vmatpush.msrb.mxu3 %v2751_v44 }
 0x7d4   :  { %1225 = vmatpush.msrb.mxu0 %v2189_v47  ;;  %1245 = vmatpush.msrb.mxu1 %v2191_v48  ;;  %v2773_v47 = vld [vmem:[%s3166_s2] sm:$0xff]  ;;  %v2779_v48 = vld [vmem:[%s3166_s2 + $0x8] sm:$0xff] }
 0x7d5   :  { %1159 = vmatpush.msrb.mxu2 %v2759_v45  ;;  %1179 = vmatpush.msrb.mxu3 %v2765_v46 }
 0x7d6   :  { %1226 = vmatpush.msrb.mxu0 %v2197_v49  ;;  %1246 = vmatpush.msrb.mxu1 %v2199_v50  ;;  %v3250_v50 = vld [vmem:[#allocation8_spill] sm:$0xff] }
 0x7d7   :  { %1160 = vmatpush.msrb.mxu2 %v2773_v47  ;;  %1180 = vmatpush.msrb.mxu3 %v2779_v48  ;;  %v174_v25 = vadd.f32 %v3250_v50, %v3246_v15 }
 0x7d8   :  { %1227 = vmatpush.msrb.mxu0 %v2205_v51  ;;  %1247 = vmatpush.msrb.mxu1 %v3238_v0 }
 0x7da   :  { %1228 = vmatpush.msrb.mxu0 %v3239_v1  ;;  %1248 = vmatpush.msrb.mxu1 %v3240_v2 }
 0x7dc   :  { %1229 = vmatpush.msrb.mxu0 %v3241_v5  ;;  %1249 = vmatpush.msrb.mxu1 %v3242_v6 }
 0x7de   :  { %1230 = vmatpush.msrb.mxu0 %v3243_v7  ;;  %1250 = vmatpush.msrb.mxu1 %v3244_v8 }
 0x83c   :  { %v892_v49 = vpop.f32.mrf.mxu1  ;;  %v872_v42 = vpop.f32.mrf.mxu0 }
 0x844   :  { %v1002_v26 = vpop.f32.mrf.mxu1  ;;  %v982_v37 = vpop.f32.mrf.mxu0 }
 0x845   :  { %v1006_v51 = vadd.f32 %v1002_v26, %v174_v25  ;;  %v1005_v36 = vadd.f32 %v982_v37, %v133_v58  ;;  %v2827_v26 = vld [vmem:[%s3168_s4 + $0x70] sm:$0xff]  ;;  %v2923_v37 = vld [vmem:[%s3168_s4] sm:$0xff] }
 0x846   :  { %v2932_v58 = vld [vmem:[#allocation4 + $0x70] sm:$0xff] }
 0x847   :  { %1838 = vtanh.f32 %v1006_v51  ;;  %v2833_v51 = vld [vmem:[%s3168_s4 + $0x78] sm:$0xff] }
 0x848   :  { %v935_v27 = vpop.f32.mrf.mxu3  ;;  %v915_v16 = vpop.f32.mrf.mxu2 }
 0x849   :  { %v936_v29 = vadd.f32 %v935_v27, %v892_v49  ;;  %v916_v9 = vadd.f32 %v915_v16, %v872_v42  ;;  %v2841_v27 = vld [vmem:[%s3168_s4 + $0x60] sm:$0xff]  ;;  %v2917_v42 = vld [vmem:[%s3168_s4 + $0x18] sm:$0xff]  ;;  %v2935_v16 = vld [vmem:[#allocation4 + $0x78] sm:$0xff] }
 0x84b   :  { %v939_v30 = vadd.f32 %v936_v29, %v3245_v13  ;;  %v938_v11 = vadd.f32 %v916_v9, %v2436_v19  ;;  %v2847_v29 = vld [vmem:[%s3168_s4 + $0x68] sm:$0xff]  ;;  %v2941_v9 = vld [vmem:[#allocation4 + $0x68] sm:$0xff] }
 0x84d   :  { %v1839_v31 = vpop.eup %1838  ;;  %1840 = vtanh.f32 %v939_v30  ;;  %v2855_v30 = vld [vmem:[%s3168_s4 + $0x50] sm:$0xff] }
 0x84e   :  { %v1010_v0 = vmul.f32 0.5, %v1839_v31  ;;  %1842 = vtanh.f32 %v1005_v36  ;;  %v2938_v36 = vld [vmem:[#allocation4 + $0x60] sm:$0xff] }
 0x84f   :  { %1844 = vtanh.f32 %v938_v11  ;;  %v2944_v11 = vld [vmem:[#allocation4 + $0x50] sm:$0xff] }
 0x850   :  { %v1012_v1 = vadd.f32 0.5, %v1010_v0  ;;  %v2869_v0 = vld [vmem:[%s3168_s4 + $0x40] sm:$0xff] }
 0x852   :  { %v1014_v2 = vsel %vm243_vm1, %v1012_v1, %v1839_v31  ;;  %v2861_v31 = vld [vmem:[%s3168_s4 + $0x58] sm:$0xff]  ;;  %v2875_v1 = vld [vmem:[%s3168_s4 + $0x48] sm:$0xff] }
 0x853   :  { %v1841_v5 = vpop.eup %1840  ;;  %1017 = vrot.lane.b32.xlu1 %v1014_v2, %s1997_s3 }
 0x854   :  { %v943_v6 = vmul.f32 0.5, %v1841_v5  ;;  %v1843_v12 = vpop.eup %1842 }
 0x855   :  { %v1009_v14 = vmul.f32 0.5, %v1843_v12  ;;  %v1845_v17 = vpop.eup %1844  ;;  %v2947_v12 = vld [vmem:[#allocation4 + $0x58] sm:$0xff] }
 0x856   :  { %v945_v7 = vadd.f32 0.5, %v943_v6  ;;  %v942_v34 = vmul.f32 0.5, %v1845_v17  ;;  %v2897_v6 = vld [vmem:[%s3168_s4 + $0x20] sm:$0xff]  ;;  %v2953_v17 = vld [vmem:[#allocation4 + $0x48] sm:$0xff] }
 0x857   :  { %v1011_v23 = vadd.f32 0.5, %v1009_v14  ;;  %v2950_v14 = vld [vmem:[#allocation4 + $0x40] sm:$0xff] }
 0x858   :  { %v947_v8 = vsel %vm243_vm1, %v945_v7, %v1841_v5  ;;  %v944_v35 = vadd.f32 0.5, %v942_v34  ;;  %v2889_v5 = vld [vmem:[%s3168_s4 + $0x38] sm:$0xff]  ;;  %v2903_v7 = vld [vmem:[%s3168_s4 + $0x28] sm:$0xff] }
 0x859   :  { %950 = vrot.lane.b32.xlu0 %v947_v8, %s1997_s3  ;;  %v1015_v40 = vmul.f32 %v1011_v23, %v2647_v53  ;;  %v2965_v34 = vld [vmem:[#allocation4 + $0x28] sm:$0xff] }
 0x85a   :  { %v948_v24 = vmul.f32 %v944_v35, %v2652_v54  ;;  %3253 = vst [vmem:[#allocation13_spill] sm:$0xff] %v2965_v34 }
 0x8c5   :  { %v1018_v28 = vpop.permute.xlu1 %1017 }
 0x8c6   :  { %v1020_v18 = vmul.f32 %v1018_v28, %v1011_v23  ;;  %v2956_v23 = vld [vmem:[#allocation4 + $0x30] sm:$0xff]  ;;  %v2959_v28 = vld [vmem:[#allocation4 + $0x38] sm:$0xff] }
 0x8c8   :  { %1022 = vrot.lane.b32.xlu0 %v1020_v18, %s1997_s3  ;;  %v2962_v18 = vld [vmem:[#allocation4 + $0x20] sm:$0xff] }
 0x8c9   :  { %3252 = vst [vmem:[#allocation12_spill] sm:$0xff] %v2962_v18 }
 0x8cb   :  { %v951_v55 = vpop.permute.xlu0 %950 }
 0x8cc   :  { %v953_v56 = vmul.f32 %v951_v55, %v944_v35  ;;  %v2968_v35 = vld [vmem:[#allocation4 + $0x10] sm:$0xff]  ;;  %v2971_v55 = vld [vmem:[#allocation4 + $0x18] sm:$0xff] }
 0x8cd   :  { %3254 = vst [vmem:[#allocation14_spill] sm:$0xff] %v2968_v35 }
 0x8ce   :  { %955 = vrot.lane.b32.xlu2 %v953_v56, %s1997_s3  ;;  %3255 = vst [vmem:[#allocation15_spill] sm:$0xff] %v2971_v55  ;;  %v2974_v56 = vld [vmem:[#allocation4] sm:$0xff] }
 0x8cf   :  { %3256 = vst [vmem:[#allocation16_spill] sm:$0xff] %v2974_v56 }
 0x928   :  { %v956_v41 = vpop.permute.xlu2 %955 }
 0x929   :  { %v2805_v38 = vadd.f32 %v956_v41, %v948_v24  ;;  %v2977_v24 = vld [vmem:[#allocation4 + $0x8] sm:$0xff] }
 0x92a   :  { %3257 = vst [vmem:[#allocation17_spill] sm:$0xff] %v2977_v24 }
 0x92b   :  { %1846 = vtanh.f32 %v2805_v38 }
 0x931   :  { %v1847_v21 = vpop.eup %1846 }
 0x932   :  { %961 = vrot.lane.b32.xlu1 %v1847_v21, %s1997_s3 }
 0x93a   :  { %v1023_v52 = vpop.permute.xlu0 %1022 }
 0x93b   :  { %v2810_v32 = vadd.f32 %v1023_v52, %v1015_v40 }
 0x93d   :  { %1848 = vtanh.f32 %v2810_v32 }
 0x943   :  { %v1849_v49 = vpop.eup %1848 }
 0x944   :  { %1028 = vrot.lane.b32.xlu2 %v1849_v49, %s1997_s3  ;;  %v3258_v49 = vld [vmem:[#allocation20_spill] sm:$0xff] }
 0x99e   :  { %v1029_v50 = vpop.permute.xlu2 %1028 }
 0x99f   :  { %v1031_v54 = vmul.f32 %v1029_v50, %v1014_v2  ;;  %v2883_v2 = vld [vmem:[%s3168_s4 + $0x30] sm:$0xff]  ;;  %v177_v50 = vadd.f32 %v3258_v49, %v3246_v15 }
 0x9a1   :  { %1768 = vmatmul.msk.f32.vlgmr.msra.gmra.mxu0 %vm244_vm2, %v1031_v54  ;;  %1769 = vmatmul.msk.f32.vlgmr.msra.gmra.mxu1 %vm244_vm2, %v1031_v54 }
 0x9a2   :  { %1333 = vmatpush.msra.mxu0 %v2675_v59  ;;  %1353 = vmatpush.msra.mxu1 %v2681_v60 }
 0x9a4   :  { %v962_v25 = vpop.permute.xlu1 %961  ;;  %1334 = vmatpush.msra.mxu0 %v2689_v61  ;;  %1354 = vmatpush.msra.mxu1 %v2695_v62 }
 0x9a5   :  { %v964_v53 = vmul.f32 %v962_v25, %v947_v8  ;;  %v2911_v8 = vld [vmem:[%s3168_s4 + $0x10] sm:$0xff] }
 0x9a6   :  { %1335 = vmatpush.msra.mxu0 %v2703_v63  ;;  %1355 = vmatpush.msra.mxu1 %v2709_v3 }
 0x9a7   :  { %1766 = vmatmul.msk.f32.vlgmr.msra.gmra.mxu2 %vm244_vm2, %v964_v53  ;;  %1767 = vmatmul.msk.f32.vlgmr.msra.gmra.mxu3 %vm244_vm2, %v964_v53 }
 0x9a8   :  { %1266 = vmatpush.msra.mxu2 %v2827_v26  ;;  %1286 = vmatpush.msra.mxu3 %v2833_v51 }
 0x9a9   :  { %1336 = vmatpush.msra.mxu0 %v2717_v4  ;;  %1356 = vmatpush.msra.mxu1 %v2723_v10 }
 0x9aa   :  { %1267 = vmatpush.msra.mxu2 %v2841_v27  ;;  %1287 = vmatpush.msra.mxu3 %v2847_v29 }
 0x9ab   :  { %1337 = vmatpush.msra.mxu0 %v2731_v20  ;;  %1357 = vmatpush.msra.mxu1 %v2737_v22 }
 0x9ac   :  { %1268 = vmatpush.msra.mxu2 %v2855_v30  ;;  %1288 = vmatpush.msra.mxu3 %v2861_v31 }
 0x9ad   :  { %1338 = vmatpush.msra.mxu0 %v2745_v43  ;;  %1358 = vmatpush.msra.mxu1 %v2751_v44 }
 0x9ae   :  { %1269 = vmatpush.msra.mxu2 %v2869_v0  ;;  %1289 = vmatpush.msra.mxu3 %v2875_v1 }
 0x9af   :  { %1770 = vmatmul.msk.f32.vlgmr.msrb.gmra.mxu2 %vm244_vm2, %v1031_v54  ;;  %1771 = vmatmul.msk.f32.vlgmr.msrb.gmra.mxu3 %vm244_vm2, %v1031_v54 }
 0x9b0   :  { %1270 = vmatpush.msra.mxu2 %v2883_v2  ;;  %1290 = vmatpush.msra.mxu3 %v2889_v5 }
 0x9b1   :  { %1339 = vmatpush.msra.mxu0 %v2759_v45  ;;  %1359 = vmatpush.msra.mxu1 %v2765_v46 }
 0x9b2   :  { %1271 = vmatpush.msra.mxu2 %v2897_v6  ;;  %1291 = vmatpush.msra.mxu3 %v2903_v7 }
 0x9b3   :  { %1340 = vmatpush.msra.mxu0 %v2773_v47  ;;  %1360 = vmatpush.msra.mxu1 %v2779_v48 }
 0x9b4   :  { %1272 = vmatpush.msra.mxu2 %v2911_v8  ;;  %1292 = vmatpush.msra.mxu3 %v2917_v42 }
 0x9b6   :  { %1273 = vmatpush.msra.mxu2 %v2923_v37  ;;  %1293 = vmatpush.msra.mxu3 %v2929_v39 }
 0x9b8   :  { %1403 = vmatpush.msrb.mxu2 %v2932_v58  ;;  %1423 = vmatpush.msrb.mxu3 %v2935_v16 }
 0x9ba   :  { %1404 = vmatpush.msrb.mxu2 %v2938_v36  ;;  %1424 = vmatpush.msrb.mxu3 %v2941_v9 }
 0x9bc   :  { %1405 = vmatpush.msrb.mxu2 %v2944_v11  ;;  %1425 = vmatpush.msrb.mxu3 %v2947_v12 }
 0x9be   :  { %1406 = vmatpush.msrb.mxu2 %v2950_v14  ;;  %1426 = vmatpush.msrb.mxu3 %v2953_v17 }
 0x9c0   :  { %1407 = vmatpush.msrb.mxu2 %v2956_v23  ;;  %1427 = vmatpush.msrb.mxu3 %v2959_v28 }
 0x9c2   :  { %1408 = vmatpush.msrb.mxu2 %v2962_v18  ;;  %1428 = vmatpush.msrb.mxu3 %v2965_v34 }
 0x9c4   :  { %1409 = vmatpush.msrb.mxu2 %v2968_v35  ;;  %1429 = vmatpush.msrb.mxu3 %v2971_v55 }
 0x9c6   :  { %1410 = vmatpush.msrb.mxu2 %v2974_v56  ;;  %1430 = vmatpush.msrb.mxu3 %v2977_v24 }
 0xa1e   :  { %v1115_v41 = vpop.f32.mrf.mxu1 }
 0xa2a   :  { %v1072_v21 = vpop.f32.mrf.mxu3 }
 0xa2b   :  { %v1116_v40 = vadd.f32 %v1115_v41, %v1072_v21 }
 0xa2d   :  { %v1119_v52 = vadd.f32 %v1116_v40, %v3245_v13  ;;  %v1052_v40 = vpop.f32.mrf.mxu2 }
 0xa2f   :  { %1850 = vtanh.f32 %v1119_v52  ;;  %v1095_v52 = vpop.f32.mrf.mxu0 }
 0xa30   :  { %v1096_v49 = vadd.f32 %v1095_v52, %v1052_v40 }
 0xa32   :  { %v1182_v54 = vpop.f32.mrf.mxu3 }
 0xa33   :  { %v1186_v25 = vadd.f32 %v1182_v54, %v177_v50  ;;  %v1118_v50 = vadd.f32 %v1096_v49, %v2436_v19 }
 0xa35   :  { %v1851_v53 = vpop.eup %1850  ;;  %1852 = vtanh.f32 %v1186_v25  ;;  %v1162_v54 = vpop.f32.mrf.mxu2 }
 0xa36   :  { %v1123_v55 = vmul.f32 0.5, %v1851_v53  ;;  %1854 = vtanh.f32 %v1118_v50 }
 0xa38   :  { %v1125_v35 = vadd.f32 0.5, %v1123_v55  ;;  %v3259_v55 = vld [vmem:[#allocation25_spill] sm:$0xff] }
 0xa39   :  { %v136_v25 = vadd.f32 %v3259_v55, %v2172_v33 }
 0xa3a   :  { %v1127_v56 = vsel %vm243_vm1, %v1125_v35, %v1851_v53 }
 0xa3b   :  { %v1853_v34 = vpop.eup %1852  ;;  %1130 = vrot.lane.b32.xlu1 %v1127_v56, %s1997_s3  ;;  %v1185_v35 = vadd.f32 %v1162_v54, %v136_v25 }
 0xa3c   :  { %v1190_v24 = vmul.f32 0.5, %v1853_v34  ;;  %v1855_v53 = vpop.eup %1854 }
 0xa3d   :  { %1856 = vtanh.f32 %v1185_v35  ;;  %v1122_v13 = vmul.f32 0.5, %v1855_v53 }
 0xa3e   :  { %v1192_v41 = vadd.f32 0.5, %v1190_v24 }
 0xa3f   :  { %v1124_v15 = vadd.f32 0.5, %v1122_v13 }
 0xa40   :  { %v1194_v21 = vsel %vm243_vm1, %v1192_v41, %v1853_v34 }
 0xa41   :  { %1197 = vrot.lane.b32.xlu0 %v1194_v21, %s1997_s3  ;;  %v1128_v13 = vmul.f32 %v1124_v15, %v2805_v38 }
 0xa43   :  { %v1857_v24 = vpop.eup %1856 }
 0xa44   :  { %v1189_v34 = vmul.f32 0.5, %v1857_v24 }
 0xa46   :  { %v1191_v18 = vadd.f32 0.5, %v1189_v34 }
 0xa48   :  { %v1195_v49 = vmul.f32 %v1191_v18, %v2810_v32 }
 0xaad   :  { %v1131_v57 = vpop.permute.xlu1 %1130 }
 0xaae   :  { %v1133_v41 = vmul.f32 %v1131_v57, %v1124_v15 }
 0xab0   :  { %1135 = vrot.lane.b32.xlu0 %v1133_v41, %s1997_s3 }
 0xab3   :  { %v1198_v40 = vpop.permute.xlu0 %1197 }
 0xab4   :  { %v1200_v52 = vmul.f32 %v1198_v40, %v1191_v18 }
 0xab6   :  { %1202 = vrot.lane.b32.xlu2 %v1200_v52, %s1997_s3 }
 0xb10   :  { %v1203_v55 = vpop.permute.xlu2 %1202 }
 0xb11   :  { %v2995_v50 = vadd.f32 %v1203_v55, %v1195_v49 }
 0xb13   :  { %1858 = vtanh.f32 %v2995_v50 }
 0xb19   :  { %v1859_v54 = vpop.eup %1858 }
 0xb1a   :  { %1208 = vrot.lane.b32.xlu1 %v1859_v54, %s1997_s3 }
 0xb22   :  { %v1136_v57 = vpop.permute.xlu0 %1135 }
 0xb23   :  { %v3000_v25 = vadd.f32 %v1136_v57, %v1128_v13 }
 0xb25   :  { %1860 = vtanh.f32 %v3000_v25 }
 0xb2b   :  { %v1861_v35 = vpop.eup %1860 }
 0xb2c   :  { %1141 = vrot.lane.b32.xlu2 %v1861_v35, %s1997_s3 }
 0xb86   :  { %v1142_v53 = vpop.permute.xlu2 %1141 }
 0xb87   :  { %v1144_v32 = vmul.f32 %v1142_v53, %v1127_v56  ;;  %v3270_v56 = vld [vmem:[#allocation26_spill] sm:$0xff] }
 0xb89   :  { %1772 = vmatmul.msk.f32.vlgmr.msrb.gmra.mxu0 %vm244_vm2, %v1144_v32  ;;  %1773 = vmatmul.msk.f32.vlgmr.msrb.gmra.mxu1 %vm244_vm2, %v1144_v32 }
 0xb8a   :  { %1446 = vmatpush.msrb.mxu0 %v2827_v26  ;;  %1466 = vmatpush.msrb.mxu1 %v2833_v51 }
 0xb8c   :  { %v1209_v18 = vpop.permute.xlu1 %1208  ;;  %1447 = vmatpush.msrb.mxu0 %v2841_v27  ;;  %1467 = vmatpush.msrb.mxu1 %v2847_v29 }
 0xb8d   :  { %v1211_v15 = vmul.f32 %v1209_v18, %v1194_v21  ;;  %v139_v21 = vadd.f32 %v3270_v56, %v2172_v33 }
 0xb8e   :  { %1448 = vmatpush.msrb.mxu0 %v2855_v30  ;;  %1468 = vmatpush.msrb.mxu1 %v2861_v31 }
 0xb8f   :  { %1774 = vmatmul.msk.f32.vlgmr.msra.gmra.mxu2 %vm244_vm2, %v1211_v15  ;;  %1775 = vmatmul.msk.f32.vlgmr.msra.gmra.mxu3 %vm244_vm2, %v1211_v15 }
 0xb90   :  { %1449 = vmatpush.msrb.mxu0 %v2869_v0  ;;  %1469 = vmatpush.msrb.mxu1 %v2875_v1 }
 0xb91   :  { %1776 = vmatmul.msk.f32.vlgmr.msra.gmra.mxu0 %vm244_vm2, %v1211_v15  ;;  %1777 = vmatmul.msk.f32.vlgmr.msra.gmra.mxu1 %vm244_vm2, %v1211_v15 }
 0xb92   :  { %1450 = vmatpush.msrb.mxu0 %v2883_v2  ;;  %1470 = vmatpush.msrb.mxu1 %v2889_v5 }
 0xb93   :  { %1513 = vmatpush.msra.mxu2 %v2675_v59  ;;  %1533 = vmatpush.msra.mxu3 %v2681_v60  ;;  %v3260_v59 = vld [vmem:[#allocation12_spill] sm:$0xff]  ;;  %v3261_v60 = vld [vmem:[#allocation13_spill] sm:$0xff] }
 0xb94   :  { %1451 = vmatpush.msrb.mxu0 %v2897_v6  ;;  %1471 = vmatpush.msrb.mxu1 %v2903_v7 }
 0xb95   :  { %1514 = vmatpush.msra.mxu2 %v2689_v61  ;;  %1534 = vmatpush.msra.mxu3 %v2695_v62  ;;  %v3262_v61 = vld [vmem:[#allocation14_spill] sm:$0xff]  ;;  %v3263_v62 = vld [vmem:[#allocation15_spill] sm:$0xff] }
 0xb96   :  { %1452 = vmatpush.msrb.mxu0 %v2911_v8  ;;  %1472 = vmatpush.msrb.mxu1 %v2917_v42 }
 0xb97   :  { %1515 = vmatpush.msra.mxu2 %v2703_v63  ;;  %1535 = vmatpush.msra.mxu3 %v2709_v3  ;;  %v3264_v63 = vld [vmem:[#allocation16_spill] sm:$0xff]  ;;  %v3265_v3 = vld [vmem:[#allocation17_spill] sm:$0xff] }
 0xb98   :  { %1453 = vmatpush.msrb.mxu0 %v2923_v37  ;;  %1473 = vmatpush.msrb.mxu1 %v2929_v39 }
 0xb99   :  { %1516 = vmatpush.msra.mxu2 %v2717_v4  ;;  %1536 = vmatpush.msra.mxu3 %v2723_v10  ;;  %v3266_v10 = vld [vmem:[#allocation10_spill] sm:$0xff] }
 0xb9a   :  { %1583 = vmatpush.msra.mxu0 %v2932_v58  ;;  %1603 = vmatpush.msra.mxu1 %v2935_v16 }
 0xb9b   :  { %1517 = vmatpush.msra.mxu2 %v2731_v20  ;;  %1537 = vmatpush.msra.mxu3 %v2737_v22  ;;  %v3267_v20 = vld [vmem:[#allocation21_spill] sm:$0xff] }
 0xb9c   :  { %1584 = vmatpush.msra.mxu0 %v2938_v36  ;;  %1604 = vmatpush.msra.mxu1 %v2941_v9  ;;  %v180_v22 = vadd.f32 %v3267_v20, %v3266_v10  ;;  %v1692_v36 = vld [vmem:[%s3171_s7 + $0x38] sm:$0xff] }
 0xb9d   :  { %1518 = vmatpush.msra.mxu2 %v2745_v43  ;;  %1538 = vmatpush.msra.mxu3 %v2751_v44 }
 0xb9e   :  { %1585 = vmatpush.msra.mxu0 %v2944_v11  ;;  %1605 = vmatpush.msra.mxu1 %v2947_v12 }
 0xb9f   :  { %1519 = vmatpush.msra.mxu2 %v2759_v45  ;;  %1539 = vmatpush.msra.mxu3 %v2765_v46 }
 0xba0   :  { %1586 = vmatpush.msra.mxu0 %v2950_v14  ;;  %1606 = vmatpush.msra.mxu1 %v2953_v17 }
 0xba1   :  { %1520 = vmatpush.msra.mxu2 %v2773_v47  ;;  %1540 = vmatpush.msra.mxu3 %v2779_v48  ;;  %v3268_v47 = vld [vmem:[#allocation19_spill] sm:$0xff] }
 0xba2   :  { %1587 = vmatpush.msra.mxu0 %v2956_v23  ;;  %1607 = vmatpush.msra.mxu1 %v2959_v28 }
 0xba4   :  { %1588 = vmatpush.msra.mxu0 %v3260_v59  ;;  %1608 = vmatpush.msra.mxu1 %v3261_v60 }
 0xba6   :  { %1589 = vmatpush.msra.mxu0 %v3262_v61  ;;  %1609 = vmatpush.msra.mxu1 %v3263_v62 }
 0xba8   :  { %1590 = vmatpush.msra.mxu0 %v3264_v63  ;;  %1610 = vmatpush.msra.mxu1 %v3265_v3 }
 0xc06   :  { %v1252_v4 = vpop.f32.mrf.mxu1  ;;  %v1232_v23 = vpop.f32.mrf.mxu0 }
 0xc0e   :  { %v1362_v43 = vpop.f32.mrf.mxu1  ;;  %v1342_v28 = vpop.f32.mrf.mxu0 }
 0xc0f   :  { %v1366_v44 = vadd.f32 %v1362_v43, %v180_v22  ;;  %v1365_v34 = vadd.f32 %v1342_v28, %v139_v21 }
 0xc11   :  { %1862 = vtanh.f32 %v1366_v44 }
 0xc12   :  { %v1295_v45 = vpop.f32.mrf.mxu3  ;;  %v1275_v24 = vpop.f32.mrf.mxu2 }
 0xc13   :  { %v1296_v46 = vadd.f32 %v1295_v45, %v1252_v4  ;;  %v1276_v41 = vadd.f32 %v1275_v24, %v1232_v23 }
 0xc15   :  { %v1299_v48 = vadd.f32 %v1296_v46, %v3268_v47  ;;  %v1298_v40 = vadd.f32 %v1276_v41, %v2436_v19 }
 0xc17   :  { %v1863_v38 = vpop.eup %1862  ;;  %1864 = vtanh.f32 %v1299_v48  ;;  %v3272_v48 = vld [vmem:[#allocation27_spill] sm:$0xff] }
 0xc18   :  { %v1370_v58 = vmul.f32 0.5, %v1863_v38  ;;  %1866 = vtanh.f32 %v1365_v34 }
 0xc19   :  { %1868 = vtanh.f32 %v1298_v40 }
 0xc1a   :  { %v1372_v16 = vadd.f32 0.5, %v1370_v58 }
 0xc1c   :  { %v1374_v9 = vsel %vm243_vm1, %v1372_v16, %v1863_v38  ;;  %v142_v38 = vadd.f32 %v3272_v48, %v2172_v33 }
 0xc1d   :  { %v1865_v11 = vpop.eup %1864  ;;  %1377 = vrot.lane.b32.xlu1 %v1374_v9, %s1997_s3 }
 0xc1e   :  { %v1303_v12 = vmul.f32 0.5, %v1865_v11  ;;  %v1867_v52 = vpop.eup %1866 }
 0xc1f   :  { %v1369_v49 = vmul.f32 0.5, %v1867_v52  ;;  %v1869_v55 = vpop.eup %1868 }
 0xc20   :  { %v1305_v14 = vadd.f32 0.5, %v1303_v12  ;;  %v1302_v35 = vmul.f32 0.5, %v1869_v55 }
 0xc21   :  { %v1371_v54 = vadd.f32 0.5, %v1369_v49 }
 0xc22   :  { %v1307_v17 = vsel %vm243_vm1, %v1305_v14, %v1865_v11  ;;  %v1304_v53 = vadd.f32 0.5, %v1302_v35 }
 0xc23   :  { %1310 = vrot.lane.b32.xlu0 %v1307_v17, %s1997_s3  ;;  %v1375_v62 = vmul.f32 %v1371_v54, %v2995_v50 }
 0xc24   :  { %v1308_v15 = vmul.f32 %v1304_v53, %v3000_v25 }
 0xc8f   :  { %v1378_v13 = vpop.permute.xlu1 %1377 }
 0xc90   :  { %v1380_v57 = vmul.f32 %v1378_v13, %v1371_v54 }
 0xc92   :  { %1382 = vrot.lane.b32.xlu0 %v1380_v57, %s1997_s3 }
 0xc95   :  { %v1311_v32 = vpop.permute.xlu0 %1310 }
 0xc96   :  { %v1313_v18 = vmul.f32 %v1311_v32, %v1304_v53 }
 0xc98   :  { %1315 = vrot.lane.b32.xlu2 %v1313_v18, %s1997_s3 }
 0xcf2   :  { %v1316_v59 = vpop.permute.xlu2 %1315 }
 0xcf3   :  { %v3073_v60 = vadd.f32 %v1316_v59, %v1308_v15 }
 0xcf5   :  { %1870 = vtanh.f32 %v3073_v60 }
 0xcfb   :  { %v1871_v61 = vpop.eup %1870 }
 0xcfc   :  { %1321 = vrot.lane.b32.xlu1 %v1871_v61, %s1997_s3 }
 0xd04   :  { %v1383_v63 = vpop.permute.xlu0 %1382 }
 0xd05   :  { %v3078_v3 = vadd.f32 %v1383_v63, %v1375_v62 }
 0xd07   :  { %1872 = vtanh.f32 %v3078_v3 }
 0xd0d   :  { %v1873_v4 = vpop.eup %1872 }
 0xd0e   :  { %1388 = vrot.lane.b32.xlu2 %v1873_v4, %s1997_s3 }
 0xd68   :  { %v1389_v20 = vpop.permute.xlu2 %1388 }
 0xd69   :  { %v1391_v25 = vmul.f32 %v1389_v20, %v1374_v9 }
 0xd6b   :  { %1780 = vmatmul.msk.f32.vlgmr.msrb.gmra.mxu0 %vm244_vm2, %v1391_v25  ;;  %1781 = vmatmul.msk.f32.vlgmr.msrb.gmra.mxu1 %vm244_vm2, %v1391_v25 }
 0xd6c   :  { %1708 = vmatpush.msrb.mxu0 %v1692_v36 }
 0xd6e   :  { %v1322_v22 = vpop.permute.xlu1 %1321 }
 0xd6f   :  { %v1324_v43 = vmul.f32 %v1322_v22, %v1307_v17 }
 0xd71   :  { %1778 = vmatmul.msk.f32.vlgmr.msrb.gmra.mxu2 %vm244_vm2, %v1324_v43  ;;  %1779 = vmatmul.msk.f32.vlgmr.msrb.gmra.mxu3 %vm244_vm2, %v1324_v43 }
 0xd72   :  { %1626 = vmatpush.msrb.mxu2 %v2827_v26  ;;  %1646 = vmatpush.msrb.mxu3 %v2833_v51 }
 0xd74   :  { %1627 = vmatpush.msrb.mxu2 %v2841_v27  ;;  %1647 = vmatpush.msrb.mxu3 %v2847_v29 }
 0xd76   :  { %1628 = vmatpush.msrb.mxu2 %v2855_v30  ;;  %1648 = vmatpush.msrb.mxu3 %v2861_v31  ;;  %v3271_v30 = vld [vmem:[#allocation22_spill] sm:$0xff] }
 0xd77   :  { %v183_v31 = vadd.f32 %v3271_v30, %v3266_v10  ;;  %v1687_v30 = vld [vmem:[%s3171_s7 + $0x10] sm:$0xff] }
 0xd78   :  { %1629 = vmatpush.msrb.mxu2 %v2869_v0  ;;  %1649 = vmatpush.msrb.mxu3 %v2875_v1 }
 0xd79   :  { %1782 = vmatmul.msk.f32.vlgmr.msra.gmra.mxu2 %vm244_vm2, %v1391_v25  ;;  %1783 = vmatmul.msk.f32.vlgmr.msra.gmra.mxu3 %vm244_vm2, %v1391_v25 }
 0xd7a   :  { %1630 = vmatpush.msrb.mxu2 %v2883_v2  ;;  %1650 = vmatpush.msrb.mxu3 %v2889_v5 }
 0xd7c   :  { %1631 = vmatpush.msrb.mxu2 %v2897_v6  ;;  %1651 = vmatpush.msrb.mxu3 %v2903_v7 }
 0xd7e   :  { %1632 = vmatpush.msrb.mxu2 %v2911_v8  ;;  %1652 = vmatpush.msrb.mxu3 %v2917_v42 }
 0xd80   :  { %1633 = vmatpush.msrb.mxu2 %v2923_v37  ;;  %1653 = vmatpush.msrb.mxu3 %v2929_v39 }
 0xde8   :  { %v1475_v26 = vpop.f32.mrf.mxu1  ;;  %v1455_v10 = vpop.f32.mrf.mxu0 }
 0xdf4   :  { %v1432_v51 = vpop.f32.mrf.mxu3  ;;  %v1412_v50 = vpop.f32.mrf.mxu2 }
 0xdf5   :  { %v1476_v27 = vadd.f32 %v1475_v26, %v1432_v51  ;;  %v1456_v44 = vadd.f32 %v1455_v10, %v1412_v50  ;;  %v1691_v51 = vld [vmem:[%s3171_s7 + $0x30] sm:$0xff] }
 0xdf6   :  { %1709 = vmatpush.msrb.mxu0 %v1691_v51 }
 0xdf7   :  { %v1479_v29 = vadd.f32 %v1476_v27, %v3268_v47  ;;  %v1478_v45 = vadd.f32 %v1456_v44, %v2436_v19  ;;  %v1689_v27 = vld [vmem:[%s3171_s7 + $0x20] sm:$0xff] }
 0xdf9   :  { %1874 = vtanh.f32 %v1479_v29  ;;  %v1688_v29 = vld [vmem:[%s3171_s7 + $0x18] sm:$0xff] }
 0xdfc   :  { %v1542_v0 = vpop.f32.mrf.mxu3  ;;  %v1522_v46 = vpop.f32.mrf.mxu2 }
 0xdfd   :  { %v1546_v1 = vadd.f32 %v1542_v0, %v183_v31  ;;  %v1545_v58 = vadd.f32 %v1522_v46, %v142_v38  ;;  %v1686_v31 = vld [vmem:[%s3171_s7 + $0x8] sm:$0xff] }
 0xdff   :  { %v1875_v2 = vpop.eup %1874  ;;  %1876 = vtanh.f32 %v1546_v1 }
 0xe00   :  { %v1483_v5 = vmul.f32 0.5, %v1875_v2  ;;  %1878 = vtanh.f32 %v1478_v45 }
 0xe01   :  { %1880 = vtanh.f32 %v1545_v58 }
 0xe02   :  { %v1485_v6 = vadd.f32 0.5, %v1483_v5 }
 0xe04   :  { %v1487_v7 = vsel %vm243_vm1, %v1485_v6, %v1875_v2  ;;  %v1685_v6 = vld [vmem:[%s3171_s7] sm:$0xff] }
 0xe05   :  { %v1877_v8 = vpop.eup %1876  ;;  %1490 = vrot.lane.b32.xlu1 %v1487_v7, %s1997_s3 }
 0xe06   :  { %v1550_v42 = vmul.f32 0.5, %v1877_v8  ;;  %v1879_v16 = vpop.eup %1878 }
 0xe07   :  { %v1482_v9 = vmul.f32 0.5, %v1879_v16  ;;  %v1881_v11 = vpop.eup %1880 }
 0xe08   :  { %v1552_v37 = vadd.f32 0.5, %v1550_v42  ;;  %v1549_v17 = vmul.f32 0.5, %v1881_v11  ;;  %v1795_v42 = vld [vmem:[%s3172_s8] ss:$0 sm:$0xff] }
 0xe09   :  { %v1484_v12 = vadd.f32 0.5, %v1482_v9 }
 0xe0a   :  { %v1554_v39 = vsel %vm243_vm1, %v1552_v37, %v1877_v8  ;;  %v1551_v28 = vadd.f32 0.5, %v1549_v17 }
 0xe0b   :  { %1557 = vrot.lane.b32.xlu0 %v1554_v39, %s1997_s3  ;;  %v1488_v40 = vmul.f32 %v1484_v12, %v3073_v60 }
 0xe0c   :  { %v1555_v24 = vmul.f32 %v1551_v28, %v3078_v3 }
 0xe77   :  { %v1491_v14 = vpop.permute.xlu1 %1490 }
 0xe78   :  { %v1493_v23 = vmul.f32 %v1491_v14, %v1484_v12 }
 0xe7a   :  { %1495 = vrot.lane.b32.xlu0 %v1493_v23, %s1997_s3 }
 0xe7d   :  { %v1558_v56 = vpop.permute.xlu0 %1557 }
 0xe7e   :  { %v1560_v21 = vmul.f32 %v1558_v56, %v1551_v28 }
 0xe80   :  { %1562 = vrot.lane.b32.xlu2 %v1560_v21, %s1997_s3 }
 0xeda   :  { %v1563_v33 = vpop.permute.xlu2 %1562 }
 0xedb   :  { %v1565_v34 = vadd.f32 %v1563_v33, %v1555_v24 }
 0xedd   :  { %1882 = vtanh.f32 %v1565_v34 }
 0xee3   :  { %v1883_v41 = vpop.eup %1882 }
 0xee4   :  { %1568 = vrot.lane.b32.xlu1 %v1883_v41, %s1997_s3 }
 0xeec   :  { %v1496_v52 = vpop.permute.xlu0 %1495 }
 0xeed   :  { %v1498_v49 = vadd.f32 %v1496_v52, %v1488_v40 }
 0xeef   :  { %1884 = vtanh.f32 %v1498_v49 }
 0xef5   :  { %v1885_v55 = vpop.eup %1884 }
 0xef6   :  { %1501 = vrot.lane.b32.xlu2 %v1885_v55, %s1997_s3 }
 0xf50   :  { %v1502_v54 = vpop.permute.xlu2 %1501 }
 0xf51   :  { %v1504_v13 = vmul.f32 %v1502_v54, %v1487_v7 }
 0xf53   :  { %1784 = vmatmul.msk.f32.vlgmr.msra.gmra.mxu0 %vm244_vm2, %v1504_v13  ;;  %1785 = vmatmul.msk.f32.vlgmr.msra.gmra.mxu1 %vm244_vm2, %v1504_v13 }
 0xf56   :  { %v1569_v57 = vpop.permute.xlu1 %1568 }
 0xf57   :  { %v1571_v35 = vmul.f32 %v1569_v57, %v1554_v39 }
 0xf59   :  { %1786 = vmatmul.msk.f32.vlgmr.msrb.gmra.mxu2 %vm244_vm2, %v1571_v35  ;;  %1787 = vmatmul.msk.f32.vlgmr.msrb.gmra.mxu3 %vm244_vm2, %v1571_v35 }
 0xfd0   :  { %v1612_v53 = vpop.f32.mrf.mxu1  ;;  %v1592_v3 = vpop.f32.mrf.mxu0 }
 0xfdc   :  { %v1655_v32 = vpop.f32.mrf.mxu3  ;;  %v1635_v63 = vpop.f32.mrf.mxu2 }
 0xfdd   :  { %v1656_v18 = vadd.f32 %v1655_v32, %v1612_v53  ;;  %v1636_v4 = vadd.f32 %v1635_v63, %v1592_v3 }
 0xfdf   :  { %v1659_v15 = vadd.f32 %v1656_v18, %v3268_v47  ;;  %v1658_v20 = vadd.f32 %v1636_v4, %v2436_v19  ;;  %v1690_v19 = vld [vmem:[%s3171_s7 + $0x28] sm:$0xff] }
 0xfe0   :  { %1710 = vmatpush.msrb.mxu0 %v1690_v19 }
 0xfe1   :  { %1886 = vtanh.f32 %v1659_v15 }
 0xfe2   :  { %1888 = vtanh.f32 %v1658_v20  ;;  %1711 = vmatpush.msrb.mxu0 %v1689_v27 }
 0xfe4   :  { %1712 = vmatpush.msrb.mxu0 %v1688_v29 }
 0xfe6   :  { %1713 = vmatpush.msrb.mxu0 %v1687_v30 }
 0xfe7   :  { %v1887_v59 = vpop.eup %1886 }
 0xfe8   :  { %v1663_v60 = vmul.f32 0.5, %v1887_v59  ;;  %v1889_v25 = vpop.eup %1888  ;;  %1714 = vmatpush.msrb.mxu0 %v1686_v31 }
 0xfe9   :  { %v1662_v22 = vmul.f32 0.5, %v1889_v25 }
 0xfea   :  { %v1665_v61 = vadd.f32 0.5, %v1663_v60  ;;  %1715 = vmatpush.msrb.mxu0 %v1685_v6 }
 0xfeb   :  { %v1664_v43 = vadd.f32 0.5, %v1662_v22 }
 0xfec   :  { %v1667_v62 = vsel %vm243_vm1, %v1665_v61, %v1887_v59 }
 0xfed   :  { %1670 = vrot.lane.b32.xlu0 %v1667_v62, %s1997_s3  ;;  %v1668_v0 = vmul.f32 %v1664_v43, %v1498_v49 }
0x105f   :  { %v1671_v26 = vpop.permute.xlu0 %1670 }
0x1060   :  { %v1673_v47 = vmul.f32 %v1671_v26, %v1664_v43 }
0x1062   :  { %1675 = vrot.lane.b32.xlu1 %v1673_v47, %s1997_s3 }
0x10d4   :  { %v1676_v1 = vpop.permute.xlu1 %1675 }
0x10d5   :  { %v1678_v2 = vadd.f32 %v1676_v1, %v1668_v0 }
0x10d7   :  { %1890 = vtanh.f32 %v1678_v2 }
0x10dd   :  { %v1891_v5 = vpop.eup %1890 }
0x10de   :  { %1681 = vrot.lane.b32.xlu2 %v1891_v5, %s1997_s3 }
0x1138   :  { %v1682_v7 = vpop.permute.xlu2 %1681 }
0x1139   :  { %v1684_v8 = vmul.f32 %v1682_v7, %v1667_v62 }
0x113b   :  { %1788 = vmatmul.msk.f32.vlgmr.msrb.gmra.mxu0 %vm244_vm2, %v1684_v8 }
0x11b8   :  { %v1717_v37 = vpop.f32.mrf.mxu0 }
0x11b9   :  { %v1718_v39 = vadd.f32 %v1795_v42, %v1717_v37 }
0x11bb   :  { %1721 = vst.msk [vmem:[%s3173_s9] sm:$0xff] %vm1720_vm3, %v1718_v39 }
0x11bc   :  { %1726 = vsyncpa [#allocation3], 1 }
0x11bd   :  { %1727 = vsyncpa [#allocation5], 1 }

</bundles_post_ra>
